<compile_context>
chip_gen: v6e
topology: v6e:2x2x1
jax: 0.10.0
libtpu: 0.0.40
codegen_flags: <defaults>
</compile_context>

<pallas_src>
import jax
import jax.numpy as jnp
from jax.experimental import pallas as pl
from jax.experimental.pallas import tpu as pltpu


def _round_up(n, m):
    return ((n + m - 1) // m) * m


def _leaky_relu(x, negative_slope=0.01):
    # F.leaky_relu default negative_slope = 0.01; single vmax per element.
    return jnp.maximum(x, negative_slope * x)


def _discriminator_kernel(x_ref,
                          w1_ref, b1_ref,
                          w2_ref, b2_ref,
                          w3_ref, b3_ref,
                          w4_ref, b4_ref,
                          out_ref):
    # x arrives as f32 straight from HBM; cast to bf16 in-kernel (free VPU work)
    # instead of paying an extra wrapper-side HBM read/write pass.
    x = x_ref[...].astype(jnp.bfloat16)

    # fc1 + leaky_relu (+ dropout = identity in eval). bf16 MXU, f32 accumulate.
    h = jnp.dot(x, w1_ref[...], preferred_element_type=jnp.float32) + b1_ref[...]
    h = _leaky_relu(h)

    # fc2 + leaky_relu
    h = jnp.dot(h.astype(jnp.bfloat16), w2_ref[...],
                preferred_element_type=jnp.float32) + b2_ref[...]
    h = _leaky_relu(h)

    # fc3 + leaky_relu
    h = jnp.dot(h.astype(jnp.bfloat16), w3_ref[...],
                preferred_element_type=jnp.float32) + b3_ref[...]
    h = _leaky_relu(h)

    # fc4 (out_features=1): VPU multiply + lane reduction instead of a
    # 1-column MXU matmul (avoids wasting 127/128 MXU lanes).
    # w4_ref is stored transposed: (1, 256) f32.
    h4 = jnp.sum(h * w4_ref[...], axis=-1, keepdims=True) + b4_ref[...]
    out_ref[...] = jax.nn.sigmoid(h4).astype(out_ref.dtype)


def prepare_params(params):
    """One-time weight prep (do at param-load time, NOT per forward call):
    bf16 weights for the MXU matmuls, f32 biases, transposed f32 fc4 weight."""
    (w1, b1), (w2, b2), (w3, b3), (w4, b4) = params
    return (
        w1.astype(jnp.bfloat16), b1.astype(jnp.float32),
        w2.astype(jnp.bfloat16), b2.astype(jnp.float32),
        w3.astype(jnp.bfloat16), b3.astype(jnp.float32),
        w4.T.astype(jnp.float32), b4.astype(jnp.float32),
    )


def _choose_tiling(B, tm):
    """Pick (TM, B_pad): sublane-aligned batch tile with >=2 grid steps when the
    batch allows (v7x has 2 TensorCores) and minimal/no padding."""
    if B <= 8:
        return B, B                       # single full-extent block, no pad
    B8 = _round_up(B, 8)
    n_steps = max(2, pl.cdiv(B8, tm))     # at least 2 parallel steps
    TM = _round_up(pl.cdiv(B8, n_steps), 8)
    return TM, n_steps * TM


def discriminator_forward(x, prepared_params, *, tm=256):
    """x: (B, seq_length, feature_size) float32.  Returns (B, 1) float32."""
    B = x.shape[0]
    x2d = x.reshape(B, -1)            # same row-major flatten as torch .view(B, -1)
    K = x2d.shape[1]

    w1b, b1, w2b, b2, w3b, b3, w4t, b4 = prepared_params

    TM, B_pad = _choose_tiling(B, tm)
    if B_pad != B:
        # Only when B is not already tile-aligned (pads <= TM-1 rows).
        x2d = jnp.pad(x2d, ((0, B_pad - B), (0, 0)))
    grid = (B_pad // TM,)

    def resident(a):
        # Full-array block with a constant block index, single-buffered:
        # stays VMEM-resident across the batch grid, no per-step re-DMA and
        # no 2x double-buffer footprint.
        nd = a.ndim
        return pl.BlockSpec(a.shape, lambda i, _nd=nd: (0,) * _nd,
                            memory_space=pltpu.VMEM,
                            pipeline_mode=pl.Buffered(1))

    in_specs = [
        pl.BlockSpec((TM, K), lambda i: (i, 0), memory_space=pltpu.VMEM),  # x tile
        resident(w1b), resident(b1),
        resident(w2b), resident(b2),
        resident(w3b), resident(b3),
        resident(w4t), resident(b4),
    ]
    out_specs = pl.BlockSpec((TM, 1), lambda i: (i, 0), memory_space=pltpu.VMEM)

    # Explicit VMEM budget: resident weights (single-buffered) + double-buffered
    # x tile + generous headroom for intermediates; capped at 64 MiB (v7x phys).
    weight_bytes = sum(int(a.size) * a.dtype.itemsize
                       for a in (w1b, b1, w2b, b2, w3b, b3, w4t, b4))
    x_tile_bytes = 2 * TM * K * 4
    act_bytes = TM * (1024 + 512 + 256) * 6      # f32 + bf16 intermediates
    vmem_limit = int(min(64 << 20,
                         max(2 * (weight_bytes + x_tile_bytes + act_bytes)
                             + (4 << 20), 16 << 20)))

    flops = 2 * B_pad * (K * 1024 + 1024 * 512 + 512 * 256 + 256)
    bytes_accessed = int(B_pad * K * 4 + weight_bytes + B_pad * 4)

    out = pl.pallas_call(
        _discriminator_kernel,
        out_shape=jax.ShapeDtypeStruct((B_pad, 1), jnp.float32),
        grid=grid,
        in_specs=in_specs,
        out_specs=out_specs,
        compiler_params=pltpu.CompilerParams(
            dimension_semantics=("parallel",),
            vmem_limit_bytes=vmem_limit),
        cost_estimate=pl.CostEstimate(
            flops=flops, transcendentals=B_pad, bytes_accessed=bytes_accessed),
    )(x2d, w1b, b1, w2b, b2, w3b, b3, w4t, b4)

    return out[:B]


def init_params(key, flatten_size):
    """Deterministic init. Weights stored as (in, out); bias as (1, out)."""
    dims = [(flatten_size, 1024), (1024, 512), (512, 256), (256, 1)]
    params = []
    for i, (din, dout) in enumerate(dims):
        kw, kb = jax.random.split(jax.random.fold_in(key, i))
        bound = 1.0 / (din ** 0.5)  # same fan-in scaling as torch nn.Linear
        w = jax.random.uniform(kw, (din, dout), jnp.float32, -bound, bound)
        b = jax.random.uniform(kb, (1, dout), jnp.float32, -bound, bound)
        params.append((w, b))
    return params


if __name__ == "__main__":
    # Small shapes consistent with the module: (batch, seq, feat) -> flatten = 128
    batch, seq_length, feature_size = 8, 32, 4
    flatten_size = seq_length * feature_size

    key = jax.random.PRNGKey(0)
    kx, kp = jax.random.split(key)
    x = jax.random.normal(kx, (batch, seq_length, feature_size), dtype=jnp.float32)
    params = init_params(kp, flatten_size)

    # One-time weight prep (bf16 cast / transpose) outside the forward path.
    prepared = jax.tree_util.tree_map(jax.block_until_ready,
                                      prepare_params(params))

    out = discriminator_forward(x, prepared)
    out = jax.block_until_ready(out)

    # Pure-JAX f32 reference (matches the PyTorch eval-mode forward).
    x2d = x.reshape(batch, -1)
    h = x2d
    for (w, b) in params[:-1]:
        z = h @ w + b
        h = jnp.where(z > 0, z, 0.01 * z)
    ref = jax.nn.sigmoid(h @ params[-1][0] + params[-1][1])

    assert out.shape == (batch, 1)
    # bf16 matmul inputs (f32 accumulation) -> looser tolerance than pure f32.
    assert jnp.allclose(out, ref, atol=3e-2, rtol=3e-2), (
        float(jnp.max(jnp.abs(out - ref))))

    print("KERNEL_OK")
</pallas_src>

<mosaic_0001>
module attributes {stable_mosaic.version = 11 : i64} {
  func.func @_discriminator_kernel(%arg0: i32, %arg1: memref<8x128xf32, #tpu.memory_space<vmem>>, %arg2: memref<128x1024xbf16, #tpu.memory_space<vmem>>, %arg3: memref<1x1024xf32, #tpu.memory_space<vmem>>, %arg4: memref<1024x512xbf16, #tpu.memory_space<vmem>>, %arg5: memref<1x512xf32, #tpu.memory_space<vmem>>, %arg6: memref<512x256xbf16, #tpu.memory_space<vmem>>, %arg7: memref<1x256xf32, #tpu.memory_space<vmem>>, %arg8: memref<1x256xf32, #tpu.memory_space<vmem>>, %arg9: memref<1x1xf32, #tpu.memory_space<vmem>>, %arg10: memref<8x1xf32, #tpu.memory_space<vmem>>) attributes {dimension_semantics = [#tpu.dimension_semantics<parallel>], iteration_bounds = array<i64: 1>, scalar_prefetch = 0 : i64, scratch_operands = 0 : i64, tpu.core_type = #tpu.core_type<tc>, window_params = [{transform_indices = @transform_0, window_bounds = array<i64: 8, 128>}, {pipeline_mode = #tpu.pipeline_mode<synchronous>, transform_indices = @transform_1, window_bounds = array<i64: 128, 1024>}, {pipeline_mode = #tpu.pipeline_mode<synchronous>, transform_indices = @transform_2, window_bounds = array<i64: 1, 1024>}, {pipeline_mode = #tpu.pipeline_mode<synchronous>, transform_indices = @transform_3, window_bounds = array<i64: 1024, 512>}, {pipeline_mode = #tpu.pipeline_mode<synchronous>, transform_indices = @transform_4, window_bounds = array<i64: 1, 512>}, {pipeline_mode = #tpu.pipeline_mode<synchronous>, transform_indices = @transform_5, window_bounds = array<i64: 512, 256>}, {pipeline_mode = #tpu.pipeline_mode<synchronous>, transform_indices = @transform_6, window_bounds = array<i64: 1, 256>}, {pipeline_mode = #tpu.pipeline_mode<synchronous>, transform_indices = @transform_7, window_bounds = array<i64: 1, 256>}, {pipeline_mode = #tpu.pipeline_mode<synchronous>, transform_indices = @transform_8, window_bounds = array<i64: 1, 1>}, {transform_indices = @transform_9, window_bounds = array<i64: 8, 1>}]} {
    %c0 = arith.constant 0 : index
    %c0_0 = arith.constant 0 : index
    %0 = vector.load %arg1[%c0, %c0_0] : memref<8x128xf32, #tpu.memory_space<vmem>>, vector<8x128xf32>
    %1 = arith.truncf %0 : vector<8x128xf32> to vector<8x128xbf16>
    %c0_1 = arith.constant 0 : index
    %c0_2 = arith.constant 0 : index
    %2 = vector.load %arg2[%c0_1, %c0_2] : memref<128x1024xbf16, #tpu.memory_space<vmem>>, vector<128x1024xbf16>
    %cst = arith.constant dense<0.000000e+00> : vector<8x1024xf32>
    %3 = tpu.matmul %1, %2, %cst {dimension_numbers = #tpu.dot_dimension_numbers<[1], [0], [0], [1], [0, 0, 1, 1], [], []>} : vector<8x128xbf16>, vector<128x1024xbf16>, vector<8x1024xf32> -> vector<8x1024xf32>
    %c0_3 = arith.constant 0 : index
    %c0_4 = arith.constant 0 : index
    %4 = vector.load %arg3[%c0_3, %c0_4] : memref<1x1024xf32, #tpu.memory_space<vmem>>, vector<1x1024xf32>
    %5 = vector.broadcast %4 : vector<1x1024xf32> to vector<8x1024xf32>
    %6 = arith.addf %3, %5 : vector<8x1024xf32>
    %cst_5 = arith.constant 0.00999999977 : f32
    %7 = vector.broadcast %cst_5 : f32 to vector<8x1024xf32>
    %8 = arith.mulf %7, %6 : vector<8x1024xf32>
    %9 = arith.maximumf %6, %8 : vector<8x1024xf32>
    %10 = arith.truncf %9 : vector<8x1024xf32> to vector<8x1024xbf16>
    %c0_6 = arith.constant 0 : index
    %c0_7 = arith.constant 0 : index
    %11 = vector.load %arg4[%c0_6, %c0_7] : memref<1024x512xbf16, #tpu.memory_space<vmem>>, vector<1024x512xbf16>
    %cst_8 = arith.constant dense<0.000000e+00> : vector<8x512xf32>
    %12 = tpu.matmul %10, %11, %cst_8 {dimension_numbers = #tpu.dot_dimension_numbers<[1], [0], [0], [1], [0, 0, 1, 1], [], []>} : vector<8x1024xbf16>, vector<1024x512xbf16>, vector<8x512xf32> -> vector<8x512xf32>
    %c0_9 = arith.constant 0 : index
    %c0_10 = arith.constant 0 : index
    %13 = vector.load %arg5[%c0_9, %c0_10] : memref<1x512xf32, #tpu.memory_space<vmem>>, vector<1x512xf32>
    %14 = vector.broadcast %13 : vector<1x512xf32> to vector<8x512xf32>
    %15 = arith.addf %12, %14 : vector<8x512xf32>
    %cst_11 = arith.constant 0.00999999977 : f32
    %16 = vector.broadcast %cst_11 : f32 to vector<8x512xf32>
    %17 = arith.mulf %16, %15 : vector<8x512xf32>
    %18 = arith.maximumf %15, %17 : vector<8x512xf32>
    %19 = arith.truncf %18 : vector<8x512xf32> to vector<8x512xbf16>
    %c0_12 = arith.constant 0 : index
    %c0_13 = arith.constant 0 : index
    %20 = vector.load %arg6[%c0_12, %c0_13] : memref<512x256xbf16, #tpu.memory_space<vmem>>, vector<512x256xbf16>
    %cst_14 = arith.constant dense<0.000000e+00> : vector<8x256xf32>
    %21 = tpu.matmul %19, %20, %cst_14 {dimension_numbers = #tpu.dot_dimension_numbers<[1], [0], [0], [1], [0, 0, 1, 1], [], []>} : vector<8x512xbf16>, vector<512x256xbf16>, vector<8x256xf32> -> vector<8x256xf32>
    %c0_15 = arith.constant 0 : index
    %c0_16 = arith.constant 0 : index
    %22 = vector.load %arg7[%c0_15, %c0_16] : memref<1x256xf32, #tpu.memory_space<vmem>>, vector<1x256xf32>
    %23 = vector.broadcast %22 : vector<1x256xf32> to vector<8x256xf32>
    %24 = arith.addf %21, %23 : vector<8x256xf32>
    %cst_17 = arith.constant 0.00999999977 : f32
    %25 = vector.broadcast %cst_17 : f32 to vector<8x256xf32>
    %26 = arith.mulf %25, %24 : vector<8x256xf32>
    %27 = arith.maximumf %24, %26 : vector<8x256xf32>
    %c0_18 = arith.constant 0 : index
    %c0_19 = arith.constant 0 : index
    %28 = vector.load %arg8[%c0_18, %c0_19] : memref<1x256xf32, #tpu.memory_space<vmem>>, vector<1x256xf32>
    %29 = vector.broadcast %28 : vector<1x256xf32> to vector<8x256xf32>
    %30 = arith.mulf %27, %29 : vector<8x256xf32>
    %cst_20 = arith.constant dense<0.000000e+00> : vector<8xf32>
    %31 = vector.multi_reduction <add>, %30, %cst_20 [1] : vector<8x256xf32> to vector<8xf32>
    %32 = vector.shape_cast %31 : vector<8xf32> to vector<8x1xf32>
    %c0_21 = arith.constant 0 : index
    %c0_22 = arith.constant 0 : index
    %33 = vector.load %arg9[%c0_21, %c0_22] : memref<1x1xf32, #tpu.memory_space<vmem>>, vector<1x1xf32>
    %34 = vector.broadcast %33 : vector<1x1xf32> to vector<8x1xf32>
    %35 = arith.addf %32, %34 : vector<8x1xf32>
    %36 = arith.negf %35 : vector<8x1xf32>
    %37 = math.exp %36 : vector<8x1xf32>
    %cst_23 = arith.constant 1.000000e+00 : f32
    %38 = vector.broadcast %cst_23 : f32 to vector<8x1xf32>
    %39 = arith.addf %38, %37 : vector<8x1xf32>
    %40 = arith.divf %38, %39 : vector<8x1xf32>
    %c0_24 = arith.constant 0 : index
    %c0_25 = arith.constant 0 : index
    %41 = vector.load %arg10[%c0_24, %c0_25] : memref<8x1xf32, #tpu.memory_space<vmem>>, vector<8x1xf32>
    tpu.vector_store %arg10[%c0_24, %c0_25], %40 {strides = array<i32>} : memref<8x1xf32, #tpu.memory_space<vmem>>, vector<8x1xf32>,
    return
  }
  func.func @transform_0(%arg0: i32) -> (i32, i32) {
    %c0_i32 = arith.constant 0 : i32
    %c0_i32_0 = arith.constant 0 : i32
    return %arg0, %c0_i32 : i32, i32
  }
  func.func @transform_1(%arg0: i32) -> (i32, i32) {
    %c0_i32 = arith.constant 0 : i32
    %c0_i32_0 = arith.constant 0 : i32
    %c0_i32_1 = arith.constant 0 : i32
    return %c0_i32, %c0_i32_0 : i32, i32
  }
  func.func @transform_2(%arg0: i32) -> (i32, i32) {
    %c0_i32 = arith.constant 0 : i32
    %c0_i32_0 = arith.constant 0 : i32
    %c0_i32_1 = arith.constant 0 : i32
    return %c0_i32, %c0_i32_0 : i32, i32
  }
  func.func @transform_3(%arg0: i32) -> (i32, i32) {
    %c0_i32 = arith.constant 0 : i32
    %c0_i32_0 = arith.constant 0 : i32
    %c0_i32_1 = arith.constant 0 : i32
    return %c0_i32, %c0_i32_0 : i32, i32
  }
  func.func @transform_4(%arg0: i32) -> (i32, i32) {
    %c0_i32 = arith.constant 0 : i32
    %c0_i32_0 = arith.constant 0 : i32
    %c0_i32_1 = arith.constant 0 : i32
    return %c0_i32, %c0_i32_0 : i32, i32
  }
  func.func @transform_5(%arg0: i32) -> (i32, i32) {
    %c0_i32 = arith.constant 0 : i32
    %c0_i32_0 = arith.constant 0 : i32
    %c0_i32_1 = arith.constant 0 : i32
    return %c0_i32, %c0_i32_0 : i32, i32
  }
  func.func @transform_6(%arg0: i32) -> (i32, i32) {
    %c0_i32 = arith.constant 0 : i32
    %c0_i32_0 = arith.constant 0 : i32
    %c0_i32_1 = arith.constant 0 : i32
    return %c0_i32, %c0_i32_0 : i32, i32
  }
  func.func @transform_7(%arg0: i32) -> (i32, i32) {
    %c0_i32 = arith.constant 0 : i32
    %c0_i32_0 = arith.constant 0 : i32
    %c0_i32_1 = arith.constant 0 : i32
    return %c0_i32, %c0_i32_0 : i32, i32
  }
  func.func @transform_8(%arg0: i32) -> (i32, i32) {
    %c0_i32 = arith.constant 0 : i32
    %c0_i32_0 = arith.constant 0 : i32
    %c0_i32_1 = arith.constant 0 : i32
    return %c0_i32, %c0_i32_0 : i32, i32
  }
  func.func @transform_9(%arg0: i32) -> (i32, i32) {
    %c0_i32 = arith.constant 0 : i32
    %c0_i32_0 = arith.constant 0 : i32
    return %arg0, %c0_i32 : i32, i32
  }
}

</mosaic_0001>

<bundles_post_ra>
// kernel: tpu_custom_call.1
= control target key start
LH: loop header
LB: loop body
LE: loop exit
PB: predicated region body
PF: predicated region fallthrough
CT: control target
= control target key end

     0   :  { %s4315_s0 = inlined_call_operand.hbm [shape: f32[8,128], index: 0, kind: input, shape index: {}]   ;;  %s4316_s1 = inlined_call_operand.hbm [shape: bf16[128,1024], index: 1, kind: input, shape index: {}]   ;;  %s4317_s2 = inlined_call_operand.hbm [shape: f32[1,1024], index: 2, kind: input, shape index: {}]   ;;  %s4318_s3 = inlined_call_operand.hbm [shape: bf16[1024,512], index: 3, kind: input, shape index: {}]   ;;  %s4319_s4 = inlined_call_operand.vmem [shape: f32[1,512], index: 4, kind: input, shape index: {}]   ;;  %s4320_s5 = inlined_call_operand.hbm [shape: bf16[512,256], index: 5, kind: input, shape index: {}]   ;;  %s4321_s6 = inlined_call_operand.vmem [shape: f32[1,256], index: 6, kind: input, shape index: {}]   ;;  %s4322_s7 = inlined_call_operand.vmem [shape: f32[1,256], index: 7, kind: input, shape index: {}]   ;;  %s4323_s8 = inlined_call_operand.<no memory space> [shape: f32[1,1], index: 8, kind: input, shape index: {}]   ;;  %s4324_s9 = inlined_call_operand.vmem [shape: f32[8,1], index: 9, kind: output, shape index: {}]  }
   0x1   :  { %v14_v0 = vstv %s4323_s8 }
   0x2   :  { %15 = vst [vmem:[#allocation2] sm:$0x1] %v14_v0 }
   0x3   :  { %16 = vsyncpa [#allocation4], 0 }
   0x4   :  { %17 = vsyncpa [#allocation6], 0 }
   0x5   :  { %18 = vsyncpa [#allocation9], 0  ;;  %s4123_s11 = smov [#allocation5]  }
   0x6   :  { %s34_s12 = sshll.u32 %s4123_s11, 4  ;;  %s35_s12 = int_to_ptr.vmem [resolvable:$true] %s34_s12 }
   0x7   :  { %s4025_s13 = scalar_lea.vmem %s35_s12, 8192  ;;  %p4030_p1 = scmp.lt.s32.totalorder %s35_s12, %s35_s12 }
   0x8   :  { %p4026_p0 = scmp.ne.s32.totalorder %s35_s12, %s4025_s13  ;;  %p4031_p2 = scmp.lt.s32.totalorder %s4025_s13, %s4025_s13 }
   0xa   :  { %p4032_p3 = por %p4031_p2, %p4030_p1 }
   0xc   :  { %p4033_p4 = pnand %p4032_p3, %p4026_p0 }
   0xe   :  { %4036 = shalt.err (!%p4033_p4)
}
   0xf   :  { %s4124_s14 = smov 512   ;;  %s4125_s15 = smov 32  }
  0x10   :  { %40 = dma.hbm_to_vmem [thread:$0]  %s4316_s1, 8192, %s35_s12, [#allocation6], %s4124_s14, %s4124_s14, %s4125_s15  }
  0x11   :  { %s4126_s8 = smov [#allocation8]  }
  0x12   :  { %s56_s18 = sshll.u32 %s4126_s8, 4  ;;  %s57_s18 = int_to_ptr.vmem [resolvable:$true] %s56_s18 }
  0x13   :  { %s4045_s19 = scalar_lea.vmem %s57_s18, 32768  ;;  %p4050_p6 = scmp.lt.s32.totalorder %s57_s18, %s57_s18 }
  0x14   :  { %p4046_p5 = scmp.ne.s32.totalorder %s57_s18, %s4045_s19  ;;  %p4051_p7 = scmp.lt.s32.totalorder %s4045_s19, %s4045_s19 }
  0x16   :  { %p4052_p8 = por %p4051_p7, %p4050_p6 }
  0x18   :  { %p4053_p9 = pnand %p4052_p8, %p4046_p5 }
  0x1a   :  { %4056 = shalt.err (!%p4053_p9)
}
  0x1b   :  { %s4127_s20 = smov 256   ;;  %s4128_s21 = smov 16  }
  0x1c   :  { %62 = dma.hbm_to_vmem [thread:$0]  %s4318_s3, 32768, %s57_s18, [#allocation9], %s4127_s20, %s4127_s20, %s4128_s21  }
  0x1d   :  { %s4129_s24 = smov [#allocation3]   ;;  %s4130_s26 = smov [#allocation7]  }
  0x1e   :  { %s25_s25 = sshll.u32 %s4129_s24, 4  ;;  %s47_s1 = sshll.u32 %s4130_s26, 4  ;;  %s26_s25 = int_to_ptr.vmem [resolvable:$true] %s25_s25  ;;  %s48_s1 = int_to_ptr.vmem [resolvable:$true] %s47_s1 }
  0x1f   :  { %s4065_s27 = scalar_lea.vmem %s26_s25, 128  ;;  %p4070_p11 = scmp.lt.s32.totalorder %s26_s25, %s26_s25 }
  0x20   :  { %p4066_p10 = scmp.ne.s32.totalorder %s26_s25, %s4065_s27  ;;  %p4071_p12 = scmp.lt.s32.totalorder %s4065_s27, %s4065_s27 }
  0x22   :  { %p4072_p13 = por %p4071_p12, %p4070_p11 }
  0x24   :  { %p4073_p0 = pnand %p4072_p13, %p4066_p10 }
  0x26   :  { %4076 = shalt.err (!%p4073_p0)
}
  0x27   :  { %28 = dma.hbm_to_vmem [thread:$0]  %s4315_s0, 128, %s26_s25, [#allocation4]  }
  0x28   :  { %s4085_s30 = scalar_lea.vmem %s48_s1, 128  ;;  %p4090_p2 = scmp.lt.s32.totalorder %s48_s1, %s48_s1 }
  0x29   :  { %p4086_p1 = scmp.ne.s32.totalorder %s48_s1, %s4085_s30  ;;  %p4091_p3 = scmp.lt.s32.totalorder %s4085_s30, %s4085_s30 }
  0x2b   :  { %p4092_p4 = por %p4091_p3, %p4090_p2 }
  0x2d   :  { %p4093_p5 = pnand %p4092_p4, %p4086_p1 }
  0x2f   :  { %4096 = shalt.err (!%p4093_p5)
}
  0x30   :  { %50 = dma.hbm_to_vmem [thread:$0]  %s4317_s2, 128, %s48_s1, [#allocation6]  }
  0x31   :  { %s4131_s11 = smov [#allocation10]  }
  0x32   :  { %s70_s12 = sshll.u32 %s4131_s11, 4  ;;  %s71_s12 = int_to_ptr.vmem [resolvable:$true] %s70_s12 }
  0x33   :  { %s4105_s13 = scalar_lea.vmem %s71_s12, 8192  ;;  %p4110_p7 = scmp.lt.s32.totalorder %s71_s12, %s71_s12 }
  0x34   :  { %p4106_p6 = scmp.ne.s32.totalorder %s71_s12, %s4105_s13  ;;  %p4111_p8 = scmp.lt.s32.totalorder %s4105_s13, %s4105_s13 }
  0x36   :  { %p4112_p9 = por %p4111_p8, %p4110_p7 }
  0x38   :  { %p4113_p10 = pnand %p4112_p9, %p4106_p6 }
  0x3a   :  { %4116 = shalt.err (!%p4113_p10)
}
  0x3b   :  { %s4132_s0 = smov 128   ;;  %s4133_s14 = smov 8  }
  0x3c   :  { %76 = dma.hbm_to_vmem [thread:$0]  %s4320_s5, 8192, %s71_s12, [#allocation9], %s4132_s0, %s4132_s0, %s4133_s14  }
  0x3d   :  { %4117 = dma.done.wait [#allocation4], 128  }
  0x3e   :  { %4118 = vsyncadd [#allocation4], 4294967168 }
  0x3f   :  { %4119 = dma.done.wait [#allocation6], 8320  }
  0x40   :  { %4120 = vsyncadd [#allocation6], 4294958976 }
  0x41   :  { %4121 = dma.done.wait [#allocation9], 40960  }
  0x42   :  { %4122 = vsyncadd [#allocation9], 4294926336  ;;  %v4134_v1 = vmov 0   ;;  %v157_v2 = vld [vmem:[#allocation5 + $0x1c0] sm:$0xff]  ;;  %v158_v4 = vld [vmem:[#allocation5 + $0x1c8] sm:$0xff]  ;;  %vm3126_vm0 = vcmask 7168  }
  0x43   :  { %559 = vmatprep.mubr.bf16.mxu0 %v4134_v1  ;;  %600 = vmatprep.mubr.bf16.mxu1 %v4134_v1  ;;  %v161_v3 = vld [vmem:[#allocation5 + $0x1e0] sm:$0xff]  ;;  %v162_v6 = vld [vmem:[#allocation5 + $0x1e8] sm:$0xff]  ;;  %v159_v63 = vld [vmem:[#allocation5 + $0x1d0] sm:$0xff] }
  0x44   :  { %v3192_v5 = vcombine.high %v157_v2, %v161_v3  ;;  %v3191_v7 = vcombine.low %v157_v2, %v161_v3  ;;  %v149_v8 = vld [vmem:[#allocation5 + $0x180] sm:$0xff]  ;;  %v3194_v10 = vcombine.high %v158_v4, %v162_v6  ;;  %v3193_v11 = vcombine.low %v158_v4, %v162_v6  ;;  %v150_v13 = vld [vmem:[#allocation5 + $0x188] sm:$0xff]  ;;  %v163_v2 = vld [vmem:[#allocation5 + $0x1f0] sm:$0xff] }
  0x45   :  { %v153_v9 = vld [vmem:[#allocation5 + $0x1a0] sm:$0xff]  ;;  %v154_v14 = vld [vmem:[#allocation5 + $0x1a8] sm:$0xff]  ;;  %v160_v3 = vld [vmem:[#allocation5 + $0x1d8] sm:$0xff] }
  0x46   :  { %v3184_v12 = vcombine.high %v149_v8, %v153_v9  ;;  %v141_v15 = vld [vmem:[#allocation5 + $0x140] sm:$0xff]  ;;  %527 = vmatprep.subr.bf16.mxu0 %v3192_v5  ;;  %v3186_v16 = vcombine.high %v150_v13, %v154_v14  ;;  %v142_v18 = vld [vmem:[#allocation5 + $0x148] sm:$0xff]  ;;  %568 = vmatprep.subr.bf16.mxu1 %v3194_v10  ;;  %v3183_v20 = vcombine.low %v149_v8, %v153_v9  ;;  %v164_v4 = vld [vmem:[#allocation5 + $0x1f8] sm:$0xff] }
  0x47   :  { %v145_v17 = vld [vmem:[#allocation5 + $0x160] sm:$0xff]  ;;  %v146_v19 = vld [vmem:[#allocation5 + $0x168] sm:$0xff]  ;;  %528 = vmatpush1.bf16.msra.mxu0 %v3191_v7  ;;  %569 = vmatpush1.bf16.msra.mxu1 %v3193_v11  ;;  %v3185_v21 = vcombine.low %v150_v13, %v154_v14  ;;  %v99_v6 = vld [vmem:[#allocation3] sm:$0xff]  ;;  %v3196_v8 = vcombine.high %v159_v63, %v163_v2  ;;  %v3198_v10 = vcombine.high %v160_v3, %v164_v4 }
  0x48   :  { %529 = vmatprep.subr.bf16.mxu0 %v3184_v12  ;;  %v3176_v22 = vcombine.high %v141_v15, %v145_v17  ;;  %570 = vmatprep.subr.bf16.mxu1 %v3186_v16  ;;  %v3178_v23 = vcombine.high %v142_v18, %v146_v19  ;;  %v133_v24 = vld [vmem:[#allocation5 + $0x100] sm:$0xff]  ;;  %v134_v26 = vld [vmem:[#allocation5 + $0x108] sm:$0xff]  ;;  %v3175_v28 = vcombine.low %v141_v15, %v145_v17  ;;  %v151_v9 = vld [vmem:[#allocation5 + $0x190] sm:$0xff] }
  0x49   :  { %v137_v25 = vld [vmem:[#allocation5 + $0x120] sm:$0xff]  ;;  %v138_v27 = vld [vmem:[#allocation5 + $0x128] sm:$0xff]  ;;  %v3177_v29 = vcombine.low %v142_v18, %v146_v19  ;;  %v155_v11 = vld [vmem:[#allocation5 + $0x1b0] sm:$0xff]  ;;  %v4205_v13 = vpack.c.bf16 %v99_v6, %v99_v6  ;;  %v3195_v15 = vcombine.low %v159_v63, %v163_v2  ;;  %v3197_v16 = vcombine.low %v160_v3, %v164_v4 }
  0x4a   :  { %v3168_v30 = vcombine.high %v133_v24, %v137_v25  ;;  %v3170_v31 = vcombine.high %v134_v26, %v138_v27  ;;  %v125_v32 = vld [vmem:[#allocation5 + $0xc0] sm:$0xff]  ;;  %v126_v34 = vld [vmem:[#allocation5 + $0xc8] sm:$0xff]  ;;  %v3167_v36 = vcombine.low %v133_v24, %v137_v25  ;;  %v3169_v37 = vcombine.low %v134_v26, %v138_v27  ;;  %v152_v12 = vld [vmem:[#allocation5 + $0x198] sm:$0xff] }
  0x4b   :  { %530 = vmatpush1.bf16.msra.mxu0 %v3183_v20  ;;  %571 = vmatpush1.bf16.msra.mxu1 %v3185_v21  ;;  %v129_v33 = vld [vmem:[#allocation5 + $0xe0] sm:$0xff]  ;;  %v130_v35 = vld [vmem:[#allocation5 + $0xe8] sm:$0xff]  ;;  %v156_v14 = vld [vmem:[#allocation5 + $0x1b8] sm:$0xff]  ;;  %v3188_v17 = vcombine.high %v151_v9, %v155_v11 }
  0x4c   :  { %531 = vmatprep.subr.bf16.mxu0 %v3176_v22  ;;  %572 = vmatprep.subr.bf16.mxu1 %v3178_v23  ;;  %v3160_v38 = vcombine.high %v125_v32, %v129_v33  ;;  %v3162_v39 = vcombine.high %v126_v34, %v130_v35  ;;  %v117_v40 = vld [vmem:[#allocation5 + $0x80] sm:$0xff]  ;;  %v118_v42 = vld [vmem:[#allocation5 + $0x88] sm:$0xff]  ;;  %v3159_v44 = vcombine.low %v125_v32, %v129_v33  ;;  %v143_v18 = vld [vmem:[#allocation5 + $0x150] sm:$0xff] }
  0x4d   :  { %v121_v41 = vld [vmem:[#allocation5 + $0xa0] sm:$0xff]  ;;  %v122_v43 = vld [vmem:[#allocation5 + $0xa8] sm:$0xff]  ;;  %v3161_v45 = vcombine.low %v126_v34, %v130_v35  ;;  %v3190_v19 = vcombine.high %v152_v12, %v156_v14  ;;  %v147_v20 = vld [vmem:[#allocation5 + $0x170] sm:$0xff]  ;;  %v3187_v23 = vcombine.low %v151_v9, %v155_v11  ;;  %v3189_v24 = vcombine.low %v152_v12, %v156_v14 }
  0x4e   :  { %v3152_v46 = vcombine.high %v117_v40, %v121_v41  ;;  %v3154_v47 = vcombine.high %v118_v42, %v122_v43  ;;  %v109_v48 = vld [vmem:[#allocation5 + $0x40] sm:$0xff]  ;;  %v110_v50 = vld [vmem:[#allocation5 + $0x48] sm:$0xff]  ;;  %v3151_v52 = vcombine.low %v117_v40, %v121_v41  ;;  %v3153_v53 = vcombine.low %v118_v42, %v122_v43  ;;  %v144_v21 = vld [vmem:[#allocation5 + $0x158] sm:$0xff] }
  0x4f   :  { %532 = vmatpush1.bf16.msra.mxu0 %v3175_v28  ;;  %573 = vmatpush1.bf16.msra.mxu1 %v3177_v29  ;;  %v113_v49 = vld [vmem:[#allocation5 + $0x60] sm:$0xff]  ;;  %v114_v51 = vld [vmem:[#allocation5 + $0x68] sm:$0xff]  ;;  %v148_v22 = vld [vmem:[#allocation5 + $0x178] sm:$0xff]  ;;  %v3180_v25 = vcombine.high %v143_v18, %v147_v20 }
  0x50   :  { %533 = vmatprep.subr.bf16.mxu0 %v3168_v30  ;;  %574 = vmatprep.subr.bf16.mxu1 %v3170_v31  ;;  %v3144_v54 = vcombine.high %v109_v48, %v113_v49  ;;  %v101_v55 = vld [vmem:[#allocation5] sm:$0xff]  ;;  %v3146_v56 = vcombine.high %v110_v50, %v114_v51  ;;  %v102_v58 = vld [vmem:[#allocation5 + $0x8] sm:$0xff]  ;;  %v3143_v60 = vcombine.low %v109_v48, %v113_v49  ;;  %v135_v26 = vld [vmem:[#allocation5 + $0x110] sm:$0xff] }
  0x51   :  { %v105_v57 = vld [vmem:[#allocation5 + $0x20] sm:$0xff]  ;;  %v106_v59 = vld [vmem:[#allocation5 + $0x28] sm:$0xff]  ;;  %v3145_v61 = vcombine.low %v110_v50, %v114_v51  ;;  %v3182_v27 = vcombine.high %v144_v21, %v148_v22  ;;  %v139_v28 = vld [vmem:[#allocation5 + $0x130] sm:$0xff]  ;;  %v3179_v31 = vcombine.low %v143_v18, %v147_v20  ;;  %v3181_v32 = vcombine.low %v144_v21, %v148_v22 }
  0x52   :  { %v3136_v62 = vcombine.high %v101_v55, %v105_v57  ;;  %v3138_v0 = vcombine.high %v102_v58, %v106_v59  ;;  %v3135_v5 = vcombine.low %v101_v55, %v105_v57  ;;  %v3137_v7 = vcombine.low %v102_v58, %v106_v59  ;;  %v136_v29 = vld [vmem:[#allocation5 + $0x118] sm:$0xff]  ;;  %v127_v34 = vld [vmem:[#allocation5 + $0xd0] sm:$0xff] }
  0x53   :  { %534 = vmatpush1.bf16.msra.mxu0 %v3167_v36  ;;  %575 = vmatpush1.bf16.msra.mxu1 %v3169_v37  ;;  %v140_v30 = vld [vmem:[#allocation5 + $0x138] sm:$0xff]  ;;  %v3172_v33 = vcombine.high %v135_v26, %v139_v28  ;;  %v131_v36 = vld [vmem:[#allocation5 + $0xf0] sm:$0xff] }
  0x54   :  { %535 = vmatprep.subr.bf16.mxu0 %v3160_v38  ;;  %576 = vmatprep.subr.bf16.mxu1 %v3162_v39  ;;  %v3174_v35 = vcombine.high %v136_v29, %v140_v30  ;;  %v128_v37 = vld [vmem:[#allocation5 + $0xd8] sm:$0xff]  ;;  %v3171_v39 = vcombine.low %v135_v26, %v139_v28  ;;  %v3173_v40 = vcombine.low %v136_v29, %v140_v30  ;;  %v119_v42 = vld [vmem:[#allocation5 + $0x90] sm:$0xff] }
  0x55   :  { %v132_v38 = vld [vmem:[#allocation5 + $0xf8] sm:$0xff]  ;;  %v3164_v41 = vcombine.high %v127_v34, %v131_v36  ;;  %v123_v43 = vld [vmem:[#allocation5 + $0xb0] sm:$0xff] }
  0x56   :  { %v3156_v48 = vcombine.high %v119_v42, %v123_v43  ;;  %v111_v49 = vld [vmem:[#allocation5 + $0x50] sm:$0xff]  ;;  %v3535_v3 = vld [vmem:[#allocation8 + $0xe4] ss:$16 sps:$4 sm:$0xff]   ;;  %v3539_v11 = vld [vmem:[#allocation8 + $0xc0] ss:$16 sps:$4 sm:$0xff]  }
  0x57   :  { %536 = vmatpush1.bf16.msra.mxu0 %v3159_v44  ;;  %577 = vmatpush1.bf16.msra.mxu1 %v3161_v45  ;;  %v120_v44 = vld [vmem:[#allocation5 + $0x98] sm:$0xff]  ;;  %v115_v51 = vld [vmem:[#allocation5 + $0x70] sm:$0xff] }
  0x58   :  { %537 = vmatprep.subr.bf16.mxu0 %v3152_v46  ;;  %578 = vmatprep.subr.bf16.mxu1 %v3154_v47  ;;  %v124_v45 = vld [vmem:[#allocation5 + $0xb8] sm:$0xff]  ;;  %v3163_v46 = vcombine.low %v127_v34, %v131_v36  ;;  %v3165_v47 = vcombine.low %v128_v37, %v132_v38  ;;  %v103_v57 = vld [vmem:[#allocation5 + $0x10] sm:$0xff] }
  0x59   :  { %v3158_v50 = vcombine.high %v120_v44, %v124_v45  ;;  %v3157_v55 = vcombine.low %v120_v44, %v124_v45  ;;  %v107_v59 = vld [vmem:[#allocation5 + $0x30] sm:$0xff]  ;;  %v3541_v9 = vld [vmem:[#allocation8 + $0xc4] ss:$16 sps:$4 sm:$0xff]   ;;  %v3542_v12 = vld [vmem:[#allocation8 + $0x2c0] ss:$16 sps:$4 sm:$0xff]  }
  0x5a   :  { %v3139_v4 = vcombine.low %v103_v57, %v107_v59  ;;  %v3547_v14 = vld [vmem:[#allocation8 + $0xa4] ss:$16 sps:$4 sm:$0xff]   ;;  %v3551_v20 = vld [vmem:[#allocation8 + $0x80] ss:$16 sps:$4 sm:$0xff]  }
  0x5b   :  { %538 = vmatpush1.bf16.msra.mxu0 %v3151_v52  ;;  %579 = vmatpush1.bf16.msra.mxu1 %v3153_v53  ;;  %v112_v52 = vld [vmem:[#allocation5 + $0x58] sm:$0xff] }
  0x5c   :  { %539 = vmatprep.subr.bf16.mxu0 %v3144_v54  ;;  %580 = vmatprep.subr.bf16.mxu1 %v3146_v56  ;;  %v116_v53 = vld [vmem:[#allocation5 + $0x78] sm:$0xff]  ;;  %v3155_v54 = vcombine.low %v119_v42, %v123_v43  ;;  %v3148_v56 = vcombine.high %v111_v49, %v115_v51 }
  0x5d   :  { %v3150_v58 = vcombine.high %v112_v52, %v116_v53  ;;  %v3149_v63 = vcombine.low %v112_v52, %v116_v53  ;;  %v3553_v18 = vld [vmem:[#allocation8 + $0x84] ss:$16 sps:$4 sm:$0xff]   ;;  %v3554_v21 = vld [vmem:[#allocation8 + $0x280] ss:$16 sps:$4 sm:$0xff]  }
  0x5e   :  { %v3559_v22 = vld [vmem:[#allocation8 + $0x64] ss:$16 sps:$4 sm:$0xff]   ;;  %v3566_v28 = vld [vmem:[#allocation8 + $0x240] ss:$16 sps:$4 sm:$0xff]  }
  0x5f   :  { %540 = vmatpush1.bf16.msra.mxu0 %v3143_v60  ;;  %581 = vmatpush1.bf16.msra.mxu1 %v3145_v61  ;;  %v104_v60 = vld [vmem:[#allocation5 + $0x18] sm:$0xff] }
  0x60   :  { %541 = vmatprep.subr.bf16.mxu0 %v3136_v62  ;;  %582 = vmatprep.subr.bf16.mxu1 %v3138_v0  ;;  %v108_v61 = vld [vmem:[#allocation5 + $0x38] sm:$0xff]  ;;  %v3147_v62 = vcombine.low %v111_v49, %v115_v51  ;;  %v3140_v0 = vcombine.high %v103_v57, %v107_v59 }
  0x61   :  { %v3142_v2 = vcombine.high %v104_v60, %v108_v61  ;;  %v3141_v6 = vcombine.low %v104_v60, %v108_v61  ;;  %v3568_v26 = vld [vmem:[#allocation8 + $0x244] ss:$16 sps:$4 sm:$0xff]   ;;  %v3578_v36 = vld [vmem:[#allocation8 + $0x200] ss:$16 sps:$4 sm:$0xff]  }
  0x62   :  { %v3571_v29 = vld [vmem:[#allocation8 + $0x24] ss:$16 sps:$4 sm:$0xff]   ;;  %v3590_v43 = vld [vmem:[#allocation8 + $0x3c0] ss:$16 sps:$4 sm:$0xff]  }
  0x63   :  { %542 = vmatpush1.bf16.msra.mxu0 %v3135_v5  ;;  %583 = vmatpush1.bf16.msra.mxu1 %v3137_v7  ;;  %v3538_v5 = vld [vmem:[#allocation8 + $0x2e4] ss:$16 sps:$4 sm:$0xff]   ;;  %v3533_v7 = vld [vmem:[#allocation8 + $0xe0] ss:$16 sps:$4 sm:$0xff]  }
  0x64   :  { %609 = vmatprep.subr.bf16.mxu0 %v3196_v8  ;;  %650 = vmatprep.subr.bf16.mxu1 %v3198_v10  ;;  %v3536_v8 = vld [vmem:[#allocation8 + $0x2e0] ss:$16 sps:$4 sm:$0xff]   ;;  %v3544_v10 = vld [vmem:[#allocation8 + $0x2c4] ss:$16 sps:$4 sm:$0xff]  }
  0x65   :  { %v3574_v30 = vld [vmem:[#allocation8 + $0x224] ss:$16 sps:$4 sm:$0xff]   ;;  %v3593_v45 = vld [vmem:[#allocation8 + $0x1a0] ss:$16 sps:$4 sm:$0xff]  }
  0x66   :  { %560 = vmatmul.mubr.bf16.vlgmr.msra.gmra.mxu0 %v4205_v13  ;;  %601 = vmatmul.mubr.bf16.vlgmr.msra.gmra.mxu1 %v4205_v13  ;;  %v3580_v34 = vld [vmem:[#allocation8 + $0x204] ss:$16 sps:$4 sm:$0xff]   ;;  %v3599_v49 = vld [vmem:[#allocation8 + $0x180] ss:$16 sps:$4 sm:$0xff]  }
  0x67   :  { %610 = vmatpush1.bf16.msra.mxu0 %v3195_v15  ;;  %651 = vmatpush1.bf16.msra.mxu1 %v3197_v16  ;;  %v3550_v15 = vld [vmem:[#allocation8 + $0x2a4] ss:$16 sps:$4 sm:$0xff]   ;;  %v3545_v16 = vld [vmem:[#allocation8 + $0xa0] ss:$16 sps:$4 sm:$0xff]  }
  0x68   :  { %611 = vmatprep.subr.bf16.mxu0 %v3188_v17  ;;  %652 = vmatprep.subr.bf16.mxu1 %v3190_v19  ;;  %v3548_v17 = vld [vmem:[#allocation8 + $0x2a0] ss:$16 sps:$4 sm:$0xff]   ;;  %v3556_v19 = vld [vmem:[#allocation8 + $0x284] ss:$16 sps:$4 sm:$0xff]  }
  0x69   :  { %641 = vmatprep.mubr.bf16.mxu0 %v4134_v1  ;;  %682 = vmatprep.mubr.bf16.mxu1 %v4134_v1  ;;  %v3166_v1 = vcombine.high %v128_v37, %v132_v38  ;;  %v3583_v37 = vld [vmem:[#allocation8 + $0x1e4] ss:$16 sps:$4 sm:$0xff]   ;;  %v3602_v51 = vld [vmem:[#allocation8 + $0x380] ss:$16 sps:$4 sm:$0xff]  }
  0x6a   :  { %v3586_v38 = vld [vmem:[#allocation8 + $0x3e4] ss:$16 sps:$4 sm:$0xff]   ;;  %v3605_v53 = vld [vmem:[#allocation8 + $0x160] ss:$16 sps:$4 sm:$0xff]  }
  0x6b   :  { %612 = vmatpush1.bf16.msra.mxu0 %v3187_v23  ;;  %653 = vmatpush1.bf16.msra.mxu1 %v3189_v24  ;;  %v3562_v23 = vld [vmem:[#allocation8 + $0x264] ss:$16 sps:$4 sm:$0xff]   ;;  %v3560_v24 = vld [vmem:[#allocation8 + $0x260] ss:$16 sps:$4 sm:$0xff]  }
  0x6c   :  { %613 = vmatprep.subr.bf16.mxu0 %v3180_v25  ;;  %654 = vmatprep.subr.bf16.mxu1 %v3182_v27  ;;  %v3565_v25 = vld [vmem:[#allocation8 + $0x44] ss:$16 sps:$4 sm:$0xff]   ;;  %v3563_v27 = vld [vmem:[#allocation8 + $0x40] ss:$16 sps:$4 sm:$0xff]  }
  0x6d   :  { %v3592_v42 = vld [vmem:[#allocation8 + $0x3c4] ss:$16 sps:$4 sm:$0xff]   ;;  %v3611_v57 = vld [vmem:[#allocation8 + $0x140] ss:$16 sps:$4 sm:$0xff]  }
  0x6e   :  { %v3595_v44 = vld [vmem:[#allocation8 + $0x1a4] ss:$16 sps:$4 sm:$0xff]   ;;  %v3614_v59 = vld [vmem:[#allocation8 + $0x340] ss:$16 sps:$4 sm:$0xff]  }
  0x6f   :  { %614 = vmatpush1.bf16.msra.mxu0 %v3179_v31  ;;  %655 = vmatpush1.bf16.msra.mxu1 %v3181_v32  ;;  %v3569_v31 = vld [vmem:[#allocation8 + $0x20] ss:$16 sps:$4 sm:$0xff]   ;;  %v3607_v52 = vld [vmem:[#allocation8 + $0x164] ss:$16 sps:$4 sm:$0xff]  }
  0x70   :  { %615 = vmatprep.subr.bf16.mxu0 %v3172_v33  ;;  %656 = vmatprep.subr.bf16.mxu1 %v3174_v35  ;;  %v3572_v32 = vld [vmem:[#allocation8 + $0x220] ss:$16 sps:$4 sm:$0xff]   ;;  %v3577_v33 = vld [vmem:[#allocation8 + $0x4] ss:$16 sps:$4 sm:$0xff]  }
  0x71   :  { %v3575_v35 = vld [vmem:[#allocation8] ss:$16 sps:$4 sm:$0xff]   ;;  %v3619_v60 = vld [vmem:[#allocation8 + $0x124] ss:$16 sps:$4 sm:$0xff]  }
  0x72   :  { %v3622_v61 = vld [vmem:[#allocation8 + $0x324] ss:$16 sps:$4 sm:$0xff]  }
  0x73   :  { %616 = vmatpush1.bf16.msra.mxu0 %v3171_v39  ;;  %657 = vmatpush1.bf16.msra.mxu1 %v3173_v40  ;;  %v3581_v39 = vld [vmem:[#allocation8 + $0x1e0] ss:$16 sps:$4 sm:$0xff]  }
  0x74   :  { %617 = vmatprep.subr.bf16.mxu0 %v3164_v41  ;;  %658 = vmatprep.subr.bf16.mxu1 %v3166_v1  ;;  %v3584_v40 = vld [vmem:[#allocation8 + $0x3e0] ss:$16 sps:$4 sm:$0xff]   ;;  %v3589_v41 = vld [vmem:[#allocation8 + $0x1c4] ss:$16 sps:$4 sm:$0xff]  }
  0x75   :  { %v3587_v1 = vld [vmem:[#allocation8 + $0x1c0] ss:$16 sps:$4 sm:$0xff]  }
  0x77   :  { %618 = vmatpush1.bf16.msra.mxu0 %v3163_v46  ;;  %659 = vmatpush1.bf16.msra.mxu1 %v3165_v47  ;;  %v3598_v46 = vld [vmem:[#allocation8 + $0x3a4] ss:$16 sps:$4 sm:$0xff]   ;;  %v3596_v47 = vld [vmem:[#allocation8 + $0x3a0] ss:$16 sps:$4 sm:$0xff]  }
  0x78   :  { %619 = vmatprep.subr.bf16.mxu0 %v3156_v48  ;;  %660 = vmatprep.subr.bf16.mxu1 %v3158_v50  ;;  %v3601_v48 = vld [vmem:[#allocation8 + $0x184] ss:$16 sps:$4 sm:$0xff]  }
  0x79   :  { %v3604_v50 = vld [vmem:[#allocation8 + $0x384] ss:$16 sps:$4 sm:$0xff]  }
  0x7b   :  { %620 = vmatpush1.bf16.msra.mxu0 %v3155_v54  ;;  %661 = vmatpush1.bf16.msra.mxu1 %v3157_v55  ;;  %v3610_v54 = vld [vmem:[#allocation8 + $0x364] ss:$16 sps:$4 sm:$0xff]   ;;  %v3608_v55 = vld [vmem:[#allocation8 + $0x360] ss:$16 sps:$4 sm:$0xff]  }
  0x7c   :  { %621 = vmatprep.subr.bf16.mxu0 %v3148_v56  ;;  %662 = vmatprep.subr.bf16.mxu1 %v3150_v58  ;;  %v3613_v56 = vld [vmem:[#allocation8 + $0x144] ss:$16 sps:$4 sm:$0xff]  }
  0x7d   :  { %v3616_v58 = vld [vmem:[#allocation8 + $0x344] ss:$16 sps:$4 sm:$0xff]  }
  0x7f   :  { %622 = vmatpush1.bf16.msra.mxu0 %v3147_v62  ;;  %663 = vmatpush1.bf16.msra.mxu1 %v3149_v63  ;;  %v3617_v62 = vld [vmem:[#allocation8 + $0x120] ss:$16 sps:$4 sm:$0xff]  }
  0x80   :  { %623 = vmatprep.subr.bf16.mxu0 %v3140_v0  ;;  %664 = vmatprep.subr.bf16.mxu1 %v3142_v2  ;;  %v3620_v63 = vld [vmem:[#allocation8 + $0x320] ss:$16 sps:$4 sm:$0xff]   ;;  %v3625_v0 = vld [vmem:[#allocation8 + $0x104] ss:$16 sps:$4 sm:$0xff]  }
  0x81   :  { %v3628_v2 = vld [vmem:[#allocation8 + $0x304] ss:$16 sps:$4 sm:$0xff]  }
  0x83   :  { %624 = vmatpush1.bf16.msra.mxu0 %v3139_v4  ;;  %665 = vmatpush1.bf16.msra.mxu1 %v3141_v6  ;;  %v3626_v4 = vld [vmem:[#allocation8 + $0x300] ss:$16 sps:$4 sm:$0xff]   ;;  %v3634_v6 = vld [vmem:[#allocation8 + $0x6e4] ss:$16 sps:$4 sm:$0xff]  }
  0x84   :  { %2273 = vmatprep.subr.bf16.mxu0 %v3535_v3  ;;  %2314 = vmatprep.subr.bf16.mxu1 %v3538_v5  ;;  %v3623_v3 = vld [vmem:[#allocation8 + $0x100] ss:$16 sps:$4 sm:$0xff]   ;;  %v3631_v5 = vld [vmem:[#allocation8 + $0x4e4] ss:$16 sps:$4 sm:$0xff]  }
  0x86   :  { %642 = vmatmul.mubr.bf16.vlgmr.msra.gmra.mxu0 %v4205_v13  ;;  %683 = vmatmul.mubr.bf16.vlgmr.msra.gmra.mxu1 %v4205_v13  ;;  %v3557_v13 = vld [vmem:[#allocation8 + $0x60] ss:$16 sps:$4 sm:$0xff]  }
  0x87   :  { %2274 = vmatpush1.bf16.msra.mxu0 %v3533_v7  ;;  %2315 = vmatpush1.bf16.msra.mxu1 %v3536_v8  ;;  %v167_v7 = vlaneseq }
  0x88   :  { %2275 = vmatprep.subr.bf16.mxu0 %v3541_v9  ;;  %2316 = vmatprep.subr.bf16.mxu1 %v3544_v10  ;;  %v4218_v10 = vld [vmem:[#allocation7] sm:$0xff] }
  0x89   :  { %v4213_v8 = vshrl.u32 %v167_v7, 7  ;;  %v3665_v7 = vld [vmem:[#allocation8 + $0x420] ss:$16 sps:$4 sm:$0xff]  }
  0x8b   :  { %2276 = vmatpush1.bf16.msra.mxu0 %v3539_v11  ;;  %2317 = vmatpush1.bf16.msra.mxu1 %v3542_v12  ;;  %v4216_v9 = vsub.s32 0, %v4213_v8  ;;  %v177_v11 = vsub.s32 2, %v4213_v8  ;;  %v4222_v12 = vsub.s32 1, %v4213_v8 }
  0x8c   :  { %2277 = vmatprep.subr.bf16.mxu0 %v3547_v14  ;;  %2318 = vmatprep.subr.bf16.mxu1 %v3550_v15  ;;  %v181_v14 = vsub.s32 3, %v4213_v8 }
  0x8d   :  { %v170_v15 = vrot.slane %v4218_v10, %v4216_v9 }
  0x8f   :  { %2278 = vmatpush1.bf16.msra.mxu0 %v3545_v16  ;;  %2319 = vmatpush1.bf16.msra.mxu1 %v3548_v17  ;;  %v178_v16 = vrot.slane %v4218_v10, %v177_v11  ;;  %v174_v17 = vrot.slane %v4218_v10, %v4222_v12 }
  0x90   :  { %2279 = vmatprep.subr.bf16.mxu0 %v3553_v18  ;;  %2320 = vmatprep.subr.bf16.mxu1 %v3556_v19  ;;  %v182_v19 = vrot.slane %v4218_v10, %v181_v14 }
  0x93   :  { %2280 = vmatpush1.bf16.msra.mxu0 %v3551_v20  ;;  %2321 = vmatpush1.bf16.msra.mxu1 %v3554_v21 }
  0x94   :  { %2281 = vmatprep.subr.bf16.mxu0 %v3559_v22  ;;  %2322 = vmatprep.subr.bf16.mxu1 %v3562_v23 }
  0x97   :  { %2282 = vmatpush1.bf16.msra.mxu0 %v3557_v13  ;;  %2323 = vmatpush1.bf16.msra.mxu1 %v3560_v24 }
  0x98   :  { %2283 = vmatprep.subr.bf16.mxu0 %v3565_v25  ;;  %2324 = vmatprep.subr.bf16.mxu1 %v3568_v26 }
  0x9b   :  { %2284 = vmatpush1.bf16.msra.mxu0 %v3563_v27  ;;  %2325 = vmatpush1.bf16.msra.mxu1 %v3566_v28 }
  0x9c   :  { %2285 = vmatprep.subr.bf16.mxu0 %v3571_v29  ;;  %2326 = vmatprep.subr.bf16.mxu1 %v3574_v30 }
  0x9f   :  { %2286 = vmatpush1.bf16.msra.mxu0 %v3569_v31  ;;  %2327 = vmatpush1.bf16.msra.mxu1 %v3572_v32 }
  0xa0   :  { %2287 = vmatprep.subr.bf16.mxu0 %v3577_v33  ;;  %2328 = vmatprep.subr.bf16.mxu1 %v3580_v34 }
  0xa3   :  { %2288 = vmatpush1.bf16.msra.mxu0 %v3575_v35  ;;  %2329 = vmatpush1.bf16.msra.mxu1 %v3578_v36 }
  0xa4   :  { %2289 = vmatprep.subr.bf16.mxu0 %v3583_v37  ;;  %2330 = vmatprep.subr.bf16.mxu1 %v3586_v38 }
  0xa7   :  { %2290 = vmatpush2.bf16.msra.mxu0 %v3581_v39  ;;  %2331 = vmatpush2.bf16.msra.mxu1 %v3584_v40  ;;  %v3629_v39 = vld [vmem:[#allocation8 + $0x4e0] ss:$16 sps:$4 sm:$0xff]  }
  0xa8   :  { %2291 = vmatprep.subr.bf16.mxu0 %v3589_v41  ;;  %2332 = vmatprep.subr.bf16.mxu1 %v3592_v42  ;;  %v3632_v42 = vld [vmem:[#allocation8 + $0x6e0] ss:$16 sps:$4 sm:$0xff]  }
  0xab   :  { %2292 = vmatpush2.bf16.msra.mxu0 %v3587_v1  ;;  %2333 = vmatpush2.bf16.msra.mxu1 %v3590_v43  ;;  %v3637_v1 = vld [vmem:[#allocation8 + $0x4c4] ss:$16 sps:$4 sm:$0xff]  }
  0xac   :  { %2293 = vmatprep.subr.bf16.mxu0 %v3595_v44  ;;  %2334 = vmatprep.subr.bf16.mxu1 %v3598_v46  ;;  %v3640_v44 = vld [vmem:[#allocation8 + $0x6c4] ss:$16 sps:$4 sm:$0xff]   ;;  %v3638_v46 = vld [vmem:[#allocation8 + $0x6c0] ss:$16 sps:$4 sm:$0xff]  }
  0xaf   :  { %2294 = vmatpush2.bf16.msra.mxu0 %v3593_v45  ;;  %2335 = vmatpush2.bf16.msra.mxu1 %v3596_v47  ;;  %v3635_v45 = vld [vmem:[#allocation8 + $0x4c0] ss:$16 sps:$4 sm:$0xff]   ;;  %v3643_v47 = vld [vmem:[#allocation8 + $0x4a4] ss:$16 sps:$4 sm:$0xff]  }
  0xb0   :  { %2295 = vmatprep.subr.bf16.mxu0 %v3601_v48  ;;  %2336 = vmatprep.subr.bf16.mxu1 %v3604_v50  ;;  %v3646_v48 = vld [vmem:[#allocation8 + $0x6a4] ss:$16 sps:$4 sm:$0xff]   ;;  %v3644_v50 = vld [vmem:[#allocation8 + $0x6a0] ss:$16 sps:$4 sm:$0xff]  }
  0xb3   :  { %2296 = vmatpush2.bf16.msra.mxu0 %v3599_v49  ;;  %2337 = vmatpush2.bf16.msra.mxu1 %v3602_v51  ;;  %v3641_v49 = vld [vmem:[#allocation8 + $0x4a0] ss:$16 sps:$4 sm:$0xff]   ;;  %v3649_v51 = vld [vmem:[#allocation8 + $0x484] ss:$16 sps:$4 sm:$0xff]  }
  0xb4   :  { %2297 = vmatprep.subr.bf16.mxu0 %v3607_v52  ;;  %2338 = vmatprep.subr.bf16.mxu1 %v3610_v54  ;;  %v3652_v52 = vld [vmem:[#allocation8 + $0x684] ss:$16 sps:$4 sm:$0xff]   ;;  %v3650_v54 = vld [vmem:[#allocation8 + $0x680] ss:$16 sps:$4 sm:$0xff]  }
  0xb7   :  { %2298 = vmatpush2.bf16.msra.mxu0 %v3605_v53  ;;  %2339 = vmatpush2.bf16.msra.mxu1 %v3608_v55  ;;  %v3647_v53 = vld [vmem:[#allocation8 + $0x480] ss:$16 sps:$4 sm:$0xff]   ;;  %v3655_v55 = vld [vmem:[#allocation8 + $0x464] ss:$16 sps:$4 sm:$0xff]  }
  0xb8   :  { %2299 = vmatprep.subr.bf16.mxu0 %v3613_v56  ;;  %2340 = vmatprep.subr.bf16.mxu1 %v3616_v58  ;;  %v3658_v56 = vld [vmem:[#allocation8 + $0x664] ss:$16 sps:$4 sm:$0xff]   ;;  %v3656_v58 = vld [vmem:[#allocation8 + $0x660] ss:$16 sps:$4 sm:$0xff]  }
  0xbb   :  { %2300 = vmatpush2.bf16.msra.mxu0 %v3611_v57  ;;  %2341 = vmatpush2.bf16.msra.mxu1 %v3614_v59  ;;  %v3653_v57 = vld [vmem:[#allocation8 + $0x460] ss:$16 sps:$4 sm:$0xff]   ;;  %v3661_v59 = vld [vmem:[#allocation8 + $0x444] ss:$16 sps:$4 sm:$0xff]  }
  0xbc   :  { %2301 = vmatprep.subr.bf16.mxu0 %v3619_v60  ;;  %2342 = vmatprep.subr.bf16.mxu1 %v3622_v61  ;;  %v3664_v60 = vld [vmem:[#allocation8 + $0x644] ss:$16 sps:$4 sm:$0xff]   ;;  %v189_v61 = vsub.s32 5, %v4213_v8 }
  0xbf   :  { %2302 = vmatpush2.bf16.msra.mxu0 %v3617_v62  ;;  %2343 = vmatpush2.bf16.msra.mxu1 %v3620_v63  ;;  %v197_v62 = vsub.s32 7, %v4213_v8  ;;  %v3659_v63 = vld [vmem:[#allocation8 + $0x440] ss:$16 sps:$4 sm:$0xff]  }
  0xc0   :  { %2303 = vmatprep.subr.bf16.mxu0 %v3625_v0  ;;  %2344 = vmatprep.subr.bf16.mxu1 %v3628_v2  ;;  %v3662_v0 = vld [vmem:[#allocation8 + $0x640] ss:$16 sps:$4 sm:$0xff]   ;;  %v3667_v2 = vld [vmem:[#allocation8 + $0x424] ss:$16 sps:$4 sm:$0xff]  }
  0xc3   :  { %2304 = vmatpush2.bf16.msra.mxu0 %v3623_v3  ;;  %2345 = vmatpush2.bf16.msra.mxu1 %v3626_v4  ;;  %v3670_v3 = vld [vmem:[#allocation8 + $0x624] ss:$16 sps:$4 sm:$0xff]   ;;  %v190_v4 = vrot.slane %v4218_v10, %v189_v61 }
  0xc4   :  { %2355 = vmatprep.subr.bf16.mxu0 %v3631_v5  ;;  %2396 = vmatprep.subr.bf16.mxu1 %v3634_v6  ;;  %v198_v6 = vrot.slane %v4218_v10, %v197_v62  ;;  %v3712_v62 = vld [vmem:[#allocation8 + $0x744] ss:$16 sps:$4 sm:$0xff]  }
 0x126   :  { %v561_v18 = vpop.f32.mrf.mxu0  ;;  %v602_v21 = vpop.f32.mrf.mxu1 }
 0x127   :  { %v562_v20 = vadd.f32 %v561_v18, %v170_v15  ;;  %v603_v22 = vadd.f32 %v602_v21, %v178_v16  ;;  %v3668_v16 = vld [vmem:[#allocation8 + $0x620] ss:$16 sps:$4 sm:$0xff]  }
 0x128   :  { %v563_v23 = vpop.f32.mrf.mxu0  ;;  %v604_v25 = vpop.f32.mrf.mxu1 }
 0x129   :  { %v691_v13 = vmul.f32 0.01, %v562_v20  ;;  %v564_v24 = vadd.f32 %v563_v23, %v174_v17  ;;  %v693_v26 = vmul.f32 0.01, %v603_v22  ;;  %v605_v27 = vadd.f32 %v604_v25, %v182_v19  ;;  %v3673_v17 = vld [vmem:[#allocation8 + $0x404] ss:$16 sps:$4 sm:$0xff]  }
 0x12a   :  { %v565_v28 = vpop.f32.mrf.mxu0  ;;  %v606_v30 = vpop.f32.mrf.mxu1  ;;  %v3676_v19 = vld [vmem:[#allocation8 + $0x604] ss:$16 sps:$4 sm:$0xff]  }
 0x12b   :  { %v692_v29 = vmul.f32 0.01, %v564_v24  ;;  %v699_v31 = vmax.f32 %v562_v20, %v691_v13  ;;  %v694_v32 = vmul.f32 0.01, %v605_v27  ;;  %v701_v34 = vmax.f32 %v603_v22, %v693_v26  ;;  %v3671_v13 = vld [vmem:[#allocation8 + $0x400] ss:$16 sps:$4 sm:$0xff]  }
 0x12c   :  { %v566_v33 = vpop.f32.mrf.mxu0  ;;  %v607_v36 = vpop.f32.mrf.mxu1  ;;  %v3674_v26 = vld [vmem:[#allocation8 + $0x600] ss:$16 sps:$4 sm:$0xff]   ;;  %v3682_v30 = vld [vmem:[#allocation8 + $0x7e4] ss:$16 sps:$4 sm:$0xff]  }
 0x12d   :  { %v700_v35 = vmax.f32 %v564_v24, %v692_v29  ;;  %v702_v37 = vmax.f32 %v605_v27, %v694_v32  ;;  %v4237_v40 = vpack.c.bf16 %v699_v31, %v699_v31  ;;  %v4241_v43 = vpack.c.bf16 %v701_v34, %v701_v34  ;;  %v3679_v27 = vld [vmem:[#allocation8 + $0x5e4] ss:$16 sps:$4 sm:$0xff]   ;;  %v3677_v34 = vld [vmem:[#allocation8 + $0x5e0] ss:$16 sps:$4 sm:$0xff]  }
 0x12e   :  { %v3680_v36 = vld [vmem:[#allocation8 + $0x7e0] ss:$16 sps:$4 sm:$0xff]  }
 0x12f   :  { %v4235_v38 = vpack.c.bf16 %v700_v35, %v700_v35  ;;  %v4239_v41 = vpack.c.bf16 %v702_v37, %v702_v37  ;;  %v3685_v37 = vld [vmem:[#allocation8 + $0x5c4] ss:$16 sps:$4 sm:$0xff]  }
 0x131   :  { %2305 = vmatprep.mubr.bf16.mxu0 %v4235_v38  ;;  %2346 = vmatprep.mubr.bf16.mxu1 %v4239_v41 }
 0x132   :  { %2306 = vmatmul.mubr.bf16.vlgmr.msra.gmra.mxu0 %v4237_v40  ;;  %2347 = vmatmul.mubr.bf16.vlgmr.msra.gmra.mxu1 %v4241_v43 }
 0x133   :  { %2356 = vmatpush1.bf16.msra.mxu0 %v3629_v39  ;;  %2397 = vmatpush1.bf16.msra.mxu1 %v3632_v42  ;;  %v3688_v42 = vld [vmem:[#allocation8 + $0x7c4] ss:$16 sps:$4 sm:$0xff]  }
 0x134   :  { %2357 = vmatprep.subr.bf16.mxu0 %v3637_v1  ;;  %2398 = vmatprep.subr.bf16.mxu1 %v3640_v44  ;;  %v3683_v1 = vld [vmem:[#allocation8 + $0x5c0] ss:$16 sps:$4 sm:$0xff]  }
 0x135   :  { %v3686_v44 = vld [vmem:[#allocation8 + $0x7c0] ss:$16 sps:$4 sm:$0xff]  }
 0x137   :  { %2358 = vmatpush1.bf16.msra.mxu0 %v3635_v45  ;;  %2399 = vmatpush1.bf16.msra.mxu1 %v3638_v46  ;;  %v3691_v45 = vld [vmem:[#allocation8 + $0x5a4] ss:$16 sps:$4 sm:$0xff]  }
 0x138   :  { %2359 = vmatprep.subr.bf16.mxu0 %v3643_v47  ;;  %2400 = vmatprep.subr.bf16.mxu1 %v3646_v48  ;;  %v3694_v46 = vld [vmem:[#allocation8 + $0x7a4] ss:$16 sps:$4 sm:$0xff]   ;;  %v3689_v47 = vld [vmem:[#allocation8 + $0x5a0] ss:$16 sps:$4 sm:$0xff]  }
 0x139   :  { %v3692_v48 = vld [vmem:[#allocation8 + $0x7a0] ss:$16 sps:$4 sm:$0xff]  }
 0x13b   :  { %2360 = vmatpush1.bf16.msra.mxu0 %v3641_v49  ;;  %2401 = vmatpush1.bf16.msra.mxu1 %v3644_v50  ;;  %v3697_v49 = vld [vmem:[#allocation8 + $0x584] ss:$16 sps:$4 sm:$0xff]  }
 0x13c   :  { %2361 = vmatprep.subr.bf16.mxu0 %v3649_v51  ;;  %2402 = vmatprep.subr.bf16.mxu1 %v3652_v52  ;;  %v3700_v50 = vld [vmem:[#allocation8 + $0x784] ss:$16 sps:$4 sm:$0xff]   ;;  %v3695_v51 = vld [vmem:[#allocation8 + $0x580] ss:$16 sps:$4 sm:$0xff]  }
 0x13d   :  { %v3698_v52 = vld [vmem:[#allocation8 + $0x780] ss:$16 sps:$4 sm:$0xff]  }
 0x13f   :  { %2362 = vmatpush1.bf16.msra.mxu0 %v3647_v53  ;;  %2403 = vmatpush1.bf16.msra.mxu1 %v3650_v54  ;;  %v185_v53 = vsub.s32 4, %v4213_v8  ;;  %v3703_v54 = vld [vmem:[#allocation8 + $0x564] ss:$16 sps:$4 sm:$0xff]  }
 0x140   :  { %2363 = vmatprep.subr.bf16.mxu0 %v3655_v55  ;;  %2404 = vmatprep.subr.bf16.mxu1 %v3658_v56  ;;  %v3706_v55 = vld [vmem:[#allocation8 + $0x764] ss:$16 sps:$4 sm:$0xff]   ;;  %v193_v56 = vsub.s32 6, %v4213_v8 }
 0x142   :  { %v194_v61 = vrot.slane %v4218_v10, %v193_v56  ;;  %v3767_v56 = vld [vmem:[#allocation8 + $0x8] ss:$16 sps:$4 sm:$0xff]  }
 0x143   :  { %2364 = vmatpush1.bf16.msra.mxu0 %v3653_v57  ;;  %2405 = vmatpush1.bf16.msra.mxu1 %v3656_v58  ;;  %v3701_v57 = vld [vmem:[#allocation8 + $0x560] ss:$16 sps:$4 sm:$0xff]   ;;  %v186_v58 = vrot.slane %v4218_v10, %v185_v53  ;;  %v3721_v10 = vld [vmem:[#allocation8 + $0x504] ss:$16 sps:$4 sm:$0xff]   ;;  %v3764_v53 = vld [vmem:[#allocation8 + $0x228] ss:$16 sps:$4 sm:$0xff]  }
 0x144   :  { %2365 = vmatprep.subr.bf16.mxu0 %v3661_v59  ;;  %2406 = vmatprep.subr.bf16.mxu1 %v3664_v60  ;;  %v3704_v59 = vld [vmem:[#allocation8 + $0x760] ss:$16 sps:$4 sm:$0xff]   ;;  %v3709_v60 = vld [vmem:[#allocation8 + $0x544] ss:$16 sps:$4 sm:$0xff]  }
 0x146   :  { %v4250_v5 = vpop.f32.mrf.mxu0  ;;  %v4253_v15 = vpop.f32.mrf.mxu1 }
 0x147   :  { %2366 = vmatpush1.bf16.msra.mxu0 %v3659_v63  ;;  %2407 = vmatpush1.bf16.msra.mxu1 %v3662_v0  ;;  %v3707_v63 = vld [vmem:[#allocation8 + $0x540] ss:$16 sps:$4 sm:$0xff]   ;;  %v644_v0 = vadd.f32 %v4250_v5, %v186_v58  ;;  %v3775_v58 = vld [vmem:[#allocation8 + $0x1ec] ss:$16 sps:$4 sm:$0xff]  }
 0x148   :  { %2367 = vmatprep.subr.bf16.mxu0 %v3667_v2  ;;  %v645_v18 = vpop.f32.mrf.mxu0  ;;  %2408 = vmatprep.subr.bf16.mxu1 %v3670_v3  ;;  %v686_v21 = vpop.f32.mrf.mxu1  ;;  %v3710_v2 = vld [vmem:[#allocation8 + $0x740] ss:$16 sps:$4 sm:$0xff]   ;;  %v3715_v3 = vld [vmem:[#allocation8 + $0x524] ss:$16 sps:$4 sm:$0xff]  }
 0x149   :  { %v646_v20 = vadd.f32 %v645_v18, %v190_v4  ;;  %v687_v23 = vadd.f32 %v686_v21, %v198_v6  ;;  %v685_v4 = vadd.f32 %v4253_v15, %v194_v61  ;;  %v3718_v6 = vld [vmem:[#allocation8 + $0x724] ss:$16 sps:$4 sm:$0xff]   ;;  %v3719_v5 = vld [vmem:[#allocation8 + $0x500] ss:$16 sps:$4 sm:$0xff]   ;;  %v3776_v61 = vld [vmem:[#allocation8 + $0x3e8] ss:$16 sps:$4 sm:$0xff]  }
 0x14a   :  { %v647_v22 = vpop.f32.mrf.mxu0  ;;  %v688_v25 = vpop.f32.mrf.mxu1  ;;  %v3722_v21 = vld [vmem:[#allocation8 + $0x700] ss:$16 sps:$4 sm:$0xff]  }
 0x14b   :  { %2368 = vmatpush1.bf16.msra.mxu0 %v3665_v7  ;;  %v696_v24 = vmul.f32 0.01, %v646_v20  ;;  %2409 = vmatpush1.bf16.msra.mxu1 %v3668_v16  ;;  %v698_v28 = vmul.f32 0.01, %v687_v23  ;;  %v3713_v7 = vld [vmem:[#allocation8 + $0x520] ss:$16 sps:$4 sm:$0xff]  }
 0x14c   :  { %2369 = vmatprep.subr.bf16.mxu0 %v3673_v17  ;;  %v648_v29 = vpop.f32.mrf.mxu0  ;;  %2410 = vmatprep.subr.bf16.mxu1 %v3676_v19  ;;  %v689_v32 = vpop.f32.mrf.mxu1  ;;  %v695_v16 = vmul.f32 0.01, %v644_v0  ;;  %v3716_v17 = vld [vmem:[#allocation8 + $0x720] ss:$16 sps:$4 sm:$0xff]   ;;  %v697_v18 = vmul.f32 0.01, %v685_v4 }
 0x14d   :  { %v704_v31 = vmax.f32 %v646_v20, %v696_v24  ;;  %v706_v33 = vmax.f32 %v687_v23, %v698_v28  ;;  %v3724_v19 = vld [vmem:[#allocation8 + $0x704] ss:$16 sps:$4 sm:$0xff]   ;;  %v3727_v22 = vld [vmem:[#allocation8 + $0xec] ss:$16 sps:$4 sm:$0xff]   ;;  %v3728_v25 = vld [vmem:[#allocation8 + $0x2e8] ss:$16 sps:$4 sm:$0xff]  }
 0x14e   :  { %v703_v20 = vmax.f32 %v644_v0, %v695_v16  ;;  %v705_v15 = vmax.f32 %v685_v4, %v697_v18  ;;  %v3730_v23 = vld [vmem:[#allocation8 + $0x2ec] ss:$16 sps:$4 sm:$0xff]   ;;  %v3731_v29 = vld [vmem:[#allocation8 + $0xc8] ss:$16 sps:$4 sm:$0xff]  }
 0x14f   :  { %2370 = vmatpush1.bf16.msra.mxu0 %v3671_v13  ;;  %v4255_v35 = vpack.c.bf16 %v704_v31, %v704_v31  ;;  %2411 = vmatpush1.bf16.msra.mxu1 %v3674_v26  ;;  %v4257_v39 = vpack.c.bf16 %v706_v33, %v706_v33  ;;  %v3725_v13 = vld [vmem:[#allocation8 + $0xe8] ss:$16 sps:$4 sm:$0xff]   ;;  %v3736_v28 = vld [vmem:[#allocation8 + $0x2cc] ss:$16 sps:$4 sm:$0xff]  }
 0x150   :  { %2371 = vmatprep.subr.bf16.mxu0 %v3679_v27  ;;  %2412 = vmatprep.subr.bf16.mxu1 %v3682_v30  ;;  %v4267_v24 = vpack.c.bf16 %v703_v20, %v703_v20  ;;  %v4269_v26 = vpack.c.bf16 %v705_v15, %v705_v15  ;;  %v3733_v27 = vld [vmem:[#allocation8 + $0xcc] ss:$16 sps:$4 sm:$0xff]   ;;  %v3734_v30 = vld [vmem:[#allocation8 + $0x2c8] ss:$16 sps:$4 sm:$0xff]  }
 0x151   :  { %2387 = vmatprep.mubr.bf16.mxu0 %v4255_v35  ;;  %2428 = vmatprep.mubr.bf16.mxu1 %v4257_v39  ;;  %v3739_v31 = vld [vmem:[#allocation8 + $0xac] ss:$16 sps:$4 sm:$0xff]   ;;  %v3737_v33 = vld [vmem:[#allocation8 + $0xa8] ss:$16 sps:$4 sm:$0xff]  }
 0x152   :  { %v3742_v32 = vld [vmem:[#allocation8 + $0x2ac] ss:$16 sps:$4 sm:$0xff]   ;;  %v3779_v0 = vld [vmem:[#allocation8 + $0x1c8] ss:$16 sps:$4 sm:$0xff]  }
 0x153   :  { %2372 = vmatpush2.bf16.msra.mxu0 %v3677_v34  ;;  %2413 = vmatpush2.bf16.msra.mxu1 %v3680_v36  ;;  %v3740_v34 = vld [vmem:[#allocation8 + $0x2a8] ss:$16 sps:$4 sm:$0xff]   ;;  %v3745_v36 = vld [vmem:[#allocation8 + $0x8c] ss:$16 sps:$4 sm:$0xff]  }
 0x154   :  { %2373 = vmatprep.subr.bf16.mxu0 %v3685_v37  ;;  %2414 = vmatprep.subr.bf16.mxu1 %v3688_v42  ;;  %v3748_v37 = vld [vmem:[#allocation8 + $0x28c] ss:$16 sps:$4 sm:$0xff]   ;;  %v3743_v42 = vld [vmem:[#allocation8 + $0x88] ss:$16 sps:$4 sm:$0xff]  }
 0x155   :  { %v3790_v4 = vld [vmem:[#allocation8 + $0x3ac] ss:$16 sps:$4 sm:$0xff]   ;;  %v3794_v18 = vld [vmem:[#allocation8 + $0x388] ss:$16 sps:$4 sm:$0xff]  }
 0x156   :  { %v3793_v16 = vld [vmem:[#allocation8 + $0x18c] ss:$16 sps:$4 sm:$0xff]   ;;  %v3797_v20 = vld [vmem:[#allocation8 + $0x168] ss:$16 sps:$4 sm:$0xff]  }
 0x157   :  { %2374 = vmatpush2.bf16.msra.mxu0 %v3683_v1  ;;  %2415 = vmatpush2.bf16.msra.mxu1 %v3686_v44  ;;  %v3751_v1 = vld [vmem:[#allocation8 + $0x6c] ss:$16 sps:$4 sm:$0xff]  }
 0x158   :  { %2375 = vmatprep.subr.bf16.mxu0 %v3691_v45  ;;  %2416 = vmatprep.subr.bf16.mxu1 %v3694_v46  ;;  %v3754_v44 = vld [vmem:[#allocation8 + $0x26c] ss:$16 sps:$4 sm:$0xff]   ;;  %v3752_v45 = vld [vmem:[#allocation8 + $0x268] ss:$16 sps:$4 sm:$0xff]  }
 0x159   :  { %v3757_v46 = vld [vmem:[#allocation8 + $0x4c] ss:$16 sps:$4 sm:$0xff]  }
 0x15a   :  { %v3808_v15 = vld [vmem:[#allocation8 + $0x34c] ss:$16 sps:$4 sm:$0xff]  }
 0x15b   :  { %2376 = vmatpush2.bf16.msra.mxu0 %v3689_v47  ;;  %2417 = vmatpush2.bf16.msra.mxu1 %v3692_v48  ;;  %v3760_v47 = vld [vmem:[#allocation8 + $0x24c] ss:$16 sps:$4 sm:$0xff]   ;;  %v3755_v48 = vld [vmem:[#allocation8 + $0x48] ss:$16 sps:$4 sm:$0xff]  }
 0x15c   :  { %2377 = vmatprep.subr.bf16.mxu0 %v3697_v49  ;;  %2418 = vmatprep.subr.bf16.mxu1 %v3700_v50  ;;  %v3758_v49 = vld [vmem:[#allocation8 + $0x248] ss:$16 sps:$4 sm:$0xff]   ;;  %v3763_v50 = vld [vmem:[#allocation8 + $0x2c] ss:$16 sps:$4 sm:$0xff]  }
 0x15f   :  { %2378 = vmatpush2.bf16.msra.mxu0 %v3695_v51  ;;  %2419 = vmatpush2.bf16.msra.mxu1 %v3698_v52  ;;  %v3766_v51 = vld [vmem:[#allocation8 + $0x22c] ss:$16 sps:$4 sm:$0xff]   ;;  %v3761_v52 = vld [vmem:[#allocation8 + $0x28] ss:$16 sps:$4 sm:$0xff]  }
 0x160   :  { %2379 = vmatprep.subr.bf16.mxu0 %v3703_v54  ;;  %2420 = vmatprep.subr.bf16.mxu1 %v3706_v55  ;;  %v3769_v54 = vld [vmem:[#allocation8 + $0xc] ss:$16 sps:$4 sm:$0xff]  }
 0x161   :  { %v3772_v55 = vld [vmem:[#allocation8 + $0x20c] ss:$16 sps:$4 sm:$0xff]  }
 0x163   :  { %2380 = vmatpush2.bf16.msra.mxu0 %v3701_v57  ;;  %2421 = vmatpush2.bf16.msra.mxu1 %v3704_v59  ;;  %v3770_v57 = vld [vmem:[#allocation8 + $0x208] ss:$16 sps:$4 sm:$0xff]   ;;  %v3778_v59 = vld [vmem:[#allocation8 + $0x3ec] ss:$16 sps:$4 sm:$0xff]  }
 0x164   :  { %2381 = vmatprep.subr.bf16.mxu0 %v3709_v60  ;;  %2422 = vmatprep.subr.bf16.mxu1 %v3712_v62  ;;  %v3773_v60 = vld [vmem:[#allocation8 + $0x1e8] ss:$16 sps:$4 sm:$0xff]   ;;  %v3781_v62 = vld [vmem:[#allocation8 + $0x1cc] ss:$16 sps:$4 sm:$0xff]  }
 0x167   :  { %2382 = vmatpush2.bf16.msra.mxu0 %v3707_v63  ;;  %2423 = vmatpush2.bf16.msra.mxu1 %v3710_v2  ;;  %v3784_v63 = vld [vmem:[#allocation8 + $0x3cc] ss:$16 sps:$4 sm:$0xff]   ;;  %v3782_v2 = vld [vmem:[#allocation8 + $0x3c8] ss:$16 sps:$4 sm:$0xff]  }
 0x168   :  { %2383 = vmatprep.subr.bf16.mxu0 %v3715_v3  ;;  %2424 = vmatprep.subr.bf16.mxu1 %v3718_v6  ;;  %v3787_v3 = vld [vmem:[#allocation8 + $0x1ac] ss:$16 sps:$4 sm:$0xff]   ;;  %v3785_v6 = vld [vmem:[#allocation8 + $0x1a8] ss:$16 sps:$4 sm:$0xff]  }
 0x16b   :  { %2384 = vmatpush2.bf16.msra.mxu0 %v3713_v7  ;;  %2425 = vmatpush2.bf16.msra.mxu1 %v3716_v17  ;;  %v3788_v7 = vld [vmem:[#allocation8 + $0x3a8] ss:$16 sps:$4 sm:$0xff]   ;;  %v3796_v17 = vld [vmem:[#allocation8 + $0x38c] ss:$16 sps:$4 sm:$0xff]  }
 0x16c   :  { %2385 = vmatprep.subr.bf16.mxu0 %v3721_v10  ;;  %2426 = vmatprep.subr.bf16.mxu1 %v3724_v19  ;;  %v3791_v10 = vld [vmem:[#allocation8 + $0x188] ss:$16 sps:$4 sm:$0xff]   ;;  %v3799_v19 = vld [vmem:[#allocation8 + $0x16c] ss:$16 sps:$4 sm:$0xff]  }
 0x16f   :  { %2386 = vmatpush2.bf16.msra.mxu0 %v3719_v5  ;;  %2427 = vmatpush2.bf16.msra.mxu1 %v3722_v21  ;;  %v3802_v5 = vld [vmem:[#allocation8 + $0x36c] ss:$16 sps:$4 sm:$0xff]   ;;  %v3800_v21 = vld [vmem:[#allocation8 + $0x368] ss:$16 sps:$4 sm:$0xff]  }
 0x170   :  { %2437 = vmatprep.subr.bf16.mxu0 %v3727_v22  ;;  %2478 = vmatprep.subr.bf16.mxu1 %v3730_v23  ;;  %v3805_v22 = vld [vmem:[#allocation8 + $0x14c] ss:$16 sps:$4 sm:$0xff]   ;;  %v3803_v23 = vld [vmem:[#allocation8 + $0x148] ss:$16 sps:$4 sm:$0xff]  }
 0x172   :  { %2388 = vmatmul.mubr.bf16.vlgmr.msra.gmra.mxu0 %v4267_v24  ;;  %2429 = vmatmul.mubr.bf16.vlgmr.msra.gmra.mxu1 %v4269_v26 }
 0x173   :  { %2438 = vmatpush1.bf16.msra.mxu0 %v3725_v13  ;;  %2469 = vmatprep.mubr.bf16.mxu0 %v4235_v38  ;;  %v3746_v38 = vld [vmem:[#allocation8 + $0x288] ss:$16 sps:$4 sm:$0xff]  }
 0x174   :  { %2479 = vmatpush1.bf16.msra.mxu1 %v3728_v25  ;;  %2510 = vmatprep.mubr.bf16.mxu1 %v4239_v41  ;;  %v3749_v41 = vld [vmem:[#allocation8 + $0x68] ss:$16 sps:$4 sm:$0xff]   ;;  %v3811_v25 = vld [vmem:[#allocation8 + $0x12c] ss:$16 sps:$4 sm:$0xff]  }
 0x175   :  { %2439 = vmatprep.subr.bf16.mxu0 %v3733_v27  ;;  %2480 = vmatprep.subr.bf16.mxu1 %v3736_v28  ;;  %v3806_v13 = vld [vmem:[#allocation8 + $0x348] ss:$16 sps:$4 sm:$0xff]   ;;  %v3814_v27 = vld [vmem:[#allocation8 + $0x32c] ss:$16 sps:$4 sm:$0xff]  }
 0x176   :  { %v3809_v28 = vld [vmem:[#allocation8 + $0x128] ss:$16 sps:$4 sm:$0xff]  }
 0x177   :  { %2440 = vmatpush1.bf16.msra.mxu0 %v3731_v29  ;;  %v3812_v29 = vld [vmem:[#allocation8 + $0x328] ss:$16 sps:$4 sm:$0xff]  }
 0x178   :  { %2481 = vmatpush1.bf16.msra.mxu1 %v3734_v30  ;;  %2441 = vmatprep.subr.bf16.mxu0 %v3739_v31  ;;  %v3817_v30 = vld [vmem:[#allocation8 + $0x10c] ss:$16 sps:$4 sm:$0xff]  }
 0x179   :  { %2482 = vmatprep.subr.bf16.mxu1 %v3742_v32  ;;  %v3820_v31 = vld [vmem:[#allocation8 + $0x30c] ss:$16 sps:$4 sm:$0xff]   ;;  %v3815_v32 = vld [vmem:[#allocation8 + $0x108] ss:$16 sps:$4 sm:$0xff]  }
 0x17b   :  { %2442 = vmatpush1.bf16.msra.mxu0 %v3737_v33  ;;  %v3818_v33 = vld [vmem:[#allocation8 + $0x308] ss:$16 sps:$4 sm:$0xff]  }
 0x17c   :  { %2483 = vmatpush1.bf16.msra.mxu1 %v3740_v34  ;;  %2443 = vmatprep.subr.bf16.mxu0 %v3745_v36  ;;  %v3823_v34 = vld [vmem:[#allocation8 + $0x4ec] ss:$16 sps:$4 sm:$0xff]  }
 0x17d   :  { %2484 = vmatprep.subr.bf16.mxu1 %v3748_v37  ;;  %v3826_v36 = vld [vmem:[#allocation8 + $0x6ec] ss:$16 sps:$4 sm:$0xff]   ;;  %v3821_v37 = vld [vmem:[#allocation8 + $0x4e8] ss:$16 sps:$4 sm:$0xff]  }
 0x17f   :  { %2444 = vmatpush1.bf16.msra.mxu0 %v3743_v42  ;;  %v3824_v42 = vld [vmem:[#allocation8 + $0x6e8] ss:$16 sps:$4 sm:$0xff]  }
 0x180   :  { %2485 = vmatpush1.bf16.msra.mxu1 %v3746_v38  ;;  %2445 = vmatprep.subr.bf16.mxu0 %v3751_v1  ;;  %v3829_v38 = vld [vmem:[#allocation8 + $0x4cc] ss:$16 sps:$4 sm:$0xff]  }
 0x181   :  { %2486 = vmatprep.subr.bf16.mxu1 %v3754_v44  ;;  %v3832_v1 = vld [vmem:[#allocation8 + $0x6cc] ss:$16 sps:$4 sm:$0xff]   ;;  %v3827_v44 = vld [vmem:[#allocation8 + $0x4c8] ss:$16 sps:$4 sm:$0xff]  }
 0x183   :  { %2446 = vmatpush1.bf16.msra.mxu0 %v3749_v41  ;;  %v3830_v41 = vld [vmem:[#allocation8 + $0x6c8] ss:$16 sps:$4 sm:$0xff]  }
 0x184   :  { %2487 = vmatpush1.bf16.msra.mxu1 %v3752_v45  ;;  %2447 = vmatprep.subr.bf16.mxu0 %v3757_v46  ;;  %v3835_v45 = vld [vmem:[#allocation8 + $0x4ac] ss:$16 sps:$4 sm:$0xff]  }
 0x185   :  { %2488 = vmatprep.subr.bf16.mxu1 %v3760_v47  ;;  %v3838_v46 = vld [vmem:[#allocation8 + $0x6ac] ss:$16 sps:$4 sm:$0xff]   ;;  %v3833_v47 = vld [vmem:[#allocation8 + $0x4a8] ss:$16 sps:$4 sm:$0xff]  }
 0x187   :  { %2448 = vmatpush1.bf16.msra.mxu0 %v3755_v48  ;;  %v3841_v48 = vld [vmem:[#allocation8 + $0x48c] ss:$16 sps:$4 sm:$0xff]  }
 0x188   :  { %2489 = vmatpush1.bf16.msra.mxu1 %v3758_v49  ;;  %2449 = vmatprep.subr.bf16.mxu0 %v3763_v50  ;;  %v3839_v49 = vld [vmem:[#allocation8 + $0x488] ss:$16 sps:$4 sm:$0xff]   ;;  %v3847_v50 = vld [vmem:[#allocation8 + $0x46c] ss:$16 sps:$4 sm:$0xff]  }
 0x189   :  { %2490 = vmatprep.subr.bf16.mxu1 %v3766_v51  ;;  %v3850_v51 = vld [vmem:[#allocation8 + $0x66c] ss:$16 sps:$4 sm:$0xff]  }
 0x18b   :  { %2450 = vmatpush1.bf16.msra.mxu0 %v3761_v52  ;;  %v3848_v52 = vld [vmem:[#allocation8 + $0x668] ss:$16 sps:$4 sm:$0xff]  }
 0x18c   :  { %2491 = vmatpush1.bf16.msra.mxu1 %v3764_v53  ;;  %2451 = vmatprep.subr.bf16.mxu0 %v3769_v54  ;;  %v3853_v53 = vld [vmem:[#allocation8 + $0x44c] ss:$16 sps:$4 sm:$0xff]  }
 0x18d   :  { %2492 = vmatprep.subr.bf16.mxu1 %v3772_v55  ;;  %v3856_v54 = vld [vmem:[#allocation8 + $0x64c] ss:$16 sps:$4 sm:$0xff]   ;;  %v3851_v55 = vld [vmem:[#allocation8 + $0x448] ss:$16 sps:$4 sm:$0xff]  }
 0x18f   :  { %2452 = vmatpush1.bf16.msra.mxu0 %v3767_v56  ;;  %v3854_v56 = vld [vmem:[#allocation8 + $0x648] ss:$16 sps:$4 sm:$0xff]  }
 0x190   :  { %2493 = vmatpush1.bf16.msra.mxu1 %v3770_v57  ;;  %2453 = vmatprep.subr.bf16.mxu0 %v3775_v58  ;;  %v3859_v57 = vld [vmem:[#allocation8 + $0x42c] ss:$16 sps:$4 sm:$0xff]  }
 0x191   :  { %2494 = vmatprep.subr.bf16.mxu1 %v3778_v59  ;;  %v3862_v58 = vld [vmem:[#allocation8 + $0x62c] ss:$16 sps:$4 sm:$0xff]   ;;  %v3857_v59 = vld [vmem:[#allocation8 + $0x428] ss:$16 sps:$4 sm:$0xff]  }
 0x193   :  { %2454 = vmatpush2.bf16.msra.mxu0 %v3773_v60  ;;  %v3860_v60 = vld [vmem:[#allocation8 + $0x628] ss:$16 sps:$4 sm:$0xff]  }
 0x194   :  { %2495 = vmatpush2.bf16.msra.mxu1 %v3776_v61  ;;  %2455 = vmatprep.subr.bf16.mxu0 %v3781_v62  ;;  %v3865_v61 = vld [vmem:[#allocation8 + $0x40c] ss:$16 sps:$4 sm:$0xff]  }
 0x195   :  { %2496 = vmatprep.subr.bf16.mxu1 %v3784_v63  ;;  %v3868_v62 = vld [vmem:[#allocation8 + $0x60c] ss:$16 sps:$4 sm:$0xff]   ;;  %v3863_v63 = vld [vmem:[#allocation8 + $0x408] ss:$16 sps:$4 sm:$0xff]  }
 0x197   :  { %2456 = vmatpush2.bf16.msra.mxu0 %v3779_v0  ;;  %v3866_v0 = vld [vmem:[#allocation8 + $0x608] ss:$16 sps:$4 sm:$0xff]  }
 0x198   :  { %2497 = vmatpush2.bf16.msra.mxu1 %v3782_v2  ;;  %2457 = vmatprep.subr.bf16.mxu0 %v3787_v3  ;;  %v3871_v2 = vld [vmem:[#allocation8 + $0x5ec] ss:$16 sps:$4 sm:$0xff]  }
 0x199   :  { %2498 = vmatprep.subr.bf16.mxu1 %v3790_v4  ;;  %v3874_v3 = vld [vmem:[#allocation8 + $0x7ec] ss:$16 sps:$4 sm:$0xff]   ;;  %v3869_v4 = vld [vmem:[#allocation8 + $0x5e8] ss:$16 sps:$4 sm:$0xff]  }
 0x19b   :  { %2458 = vmatpush2.bf16.msra.mxu0 %v3785_v6  ;;  %v3872_v6 = vld [vmem:[#allocation8 + $0x7e8] ss:$16 sps:$4 sm:$0xff]  }
 0x19c   :  { %2499 = vmatpush2.bf16.msra.mxu1 %v3788_v7  ;;  %2459 = vmatprep.subr.bf16.mxu0 %v3793_v16  ;;  %v3877_v7 = vld [vmem:[#allocation8 + $0x5cc] ss:$16 sps:$4 sm:$0xff]  }
 0x19d   :  { %2500 = vmatprep.subr.bf16.mxu1 %v3796_v17  ;;  %v3880_v16 = vld [vmem:[#allocation8 + $0x7cc] ss:$16 sps:$4 sm:$0xff]   ;;  %v3875_v17 = vld [vmem:[#allocation8 + $0x5c8] ss:$16 sps:$4 sm:$0xff]  }
 0x19f   :  { %2460 = vmatpush2.bf16.msra.mxu0 %v3791_v10  ;;  %v3878_v10 = vld [vmem:[#allocation8 + $0x7c8] ss:$16 sps:$4 sm:$0xff]  }
 0x1a0   :  { %2501 = vmatpush2.bf16.msra.mxu1 %v3794_v18  ;;  %2461 = vmatprep.subr.bf16.mxu0 %v3799_v19  ;;  %v3883_v18 = vld [vmem:[#allocation8 + $0x5ac] ss:$16 sps:$4 sm:$0xff]  }
 0x1a1   :  { %2502 = vmatprep.subr.bf16.mxu1 %v3802_v5  ;;  %v3886_v19 = vld [vmem:[#allocation8 + $0x7ac] ss:$16 sps:$4 sm:$0xff]   ;;  %v3881_v5 = vld [vmem:[#allocation8 + $0x5a8] ss:$16 sps:$4 sm:$0xff]  }
 0x1a3   :  { %2462 = vmatpush2.bf16.msra.mxu0 %v3797_v20  ;;  %v3884_v20 = vld [vmem:[#allocation8 + $0x7a8] ss:$16 sps:$4 sm:$0xff]  }
 0x1a4   :  { %2503 = vmatpush2.bf16.msra.mxu1 %v3800_v21  ;;  %2463 = vmatprep.subr.bf16.mxu0 %v3805_v22  ;;  %v3889_v21 = vld [vmem:[#allocation8 + $0x58c] ss:$16 sps:$4 sm:$0xff]  }
 0x1a5   :  { %2504 = vmatprep.subr.bf16.mxu1 %v3808_v15  ;;  %v3892_v22 = vld [vmem:[#allocation8 + $0x78c] ss:$16 sps:$4 sm:$0xff]   ;;  %v3887_v15 = vld [vmem:[#allocation8 + $0x588] ss:$16 sps:$4 sm:$0xff]  }
 0x1a7   :  { %2464 = vmatpush2.bf16.msra.mxu0 %v3803_v23  ;;  %v3890_v23 = vld [vmem:[#allocation8 + $0x788] ss:$16 sps:$4 sm:$0xff]  }
 0x1a8   :  { %2505 = vmatpush2.bf16.msra.mxu1 %v3806_v13  ;;  %2465 = vmatprep.subr.bf16.mxu0 %v3811_v25  ;;  %v3895_v13 = vld [vmem:[#allocation8 + $0x56c] ss:$16 sps:$4 sm:$0xff]  }
 0x1a9   :  { %2506 = vmatprep.subr.bf16.mxu1 %v3814_v27  ;;  %v3898_v25 = vld [vmem:[#allocation8 + $0x76c] ss:$16 sps:$4 sm:$0xff]   ;;  %v3893_v27 = vld [vmem:[#allocation8 + $0x568] ss:$16 sps:$4 sm:$0xff]  }
 0x1ab   :  { %2466 = vmatpush2.bf16.msra.mxu0 %v3809_v28  ;;  %v3896_v28 = vld [vmem:[#allocation8 + $0x768] ss:$16 sps:$4 sm:$0xff]  }
 0x1ac   :  { %2507 = vmatpush2.bf16.msra.mxu1 %v3812_v29  ;;  %2467 = vmatprep.subr.bf16.mxu0 %v3817_v30  ;;  %v3901_v29 = vld [vmem:[#allocation8 + $0x54c] ss:$16 sps:$4 sm:$0xff]  }
 0x1ad   :  { %2508 = vmatprep.subr.bf16.mxu1 %v3820_v31  ;;  %v3904_v30 = vld [vmem:[#allocation8 + $0x74c] ss:$16 sps:$4 sm:$0xff]   ;;  %v3899_v31 = vld [vmem:[#allocation8 + $0x548] ss:$16 sps:$4 sm:$0xff]  }
 0x1af   :  { %2468 = vmatpush2.bf16.msra.mxu0 %v3815_v32  ;;  %v3902_v32 = vld [vmem:[#allocation8 + $0x748] ss:$16 sps:$4 sm:$0xff]  }
 0x1b0   :  { %2509 = vmatpush2.bf16.msra.mxu1 %v3818_v33  ;;  %2519 = vmatprep.subr.bf16.mxu0 %v3823_v34  ;;  %v3907_v33 = vld [vmem:[#allocation8 + $0x52c] ss:$16 sps:$4 sm:$0xff]  }
 0x1b1   :  { %2560 = vmatprep.subr.bf16.mxu1 %v3826_v36  ;;  %v3910_v34 = vld [vmem:[#allocation8 + $0x72c] ss:$16 sps:$4 sm:$0xff]   ;;  %v3905_v36 = vld [vmem:[#allocation8 + $0x528] ss:$16 sps:$4 sm:$0xff]  }
 0x1b2   :  { %2470 = vmatmul.mubr.bf16.vlgmr.msra.gmra.mxu0 %v4237_v40  ;;  %v3836_v40 = vld [vmem:[#allocation8 + $0x6a8] ss:$16 sps:$4 sm:$0xff]  }
 0x1b3   :  { %2511 = vmatmul.mubr.bf16.vlgmr.msra.gmra.mxu1 %v4241_v43  ;;  %2520 = vmatpush1.bf16.msra.mxu0 %v3821_v37  ;;  %v3844_v43 = vld [vmem:[#allocation8 + $0x68c] ss:$16 sps:$4 sm:$0xff]   ;;  %v3908_v37 = vld [vmem:[#allocation8 + $0x728] ss:$16 sps:$4 sm:$0xff]  }
 0x1b4   :  { %2551 = vmatprep.mubr.bf16.mxu0 %v4255_v35  ;;  %2561 = vmatpush1.bf16.msra.mxu1 %v3824_v42  ;;  %v3842_v35 = vld [vmem:[#allocation8 + $0x688] ss:$16 sps:$4 sm:$0xff]   ;;  %v3913_v42 = vld [vmem:[#allocation8 + $0x50c] ss:$16 sps:$4 sm:$0xff]  }
 0x1b5   :  { %2592 = vmatprep.mubr.bf16.mxu1 %v4257_v39  ;;  %2521 = vmatprep.subr.bf16.mxu0 %v3829_v38  ;;  %v3845_v39 = vld [vmem:[#allocation8 + $0x468] ss:$16 sps:$4 sm:$0xff]   ;;  %v3916_v38 = vld [vmem:[#allocation8 + $0x70c] ss:$16 sps:$4 sm:$0xff]  }
 0x1b6   :  { %2562 = vmatprep.subr.bf16.mxu1 %v3832_v1  ;;  %v3911_v1 = vld [vmem:[#allocation8 + $0x508] ss:$16 sps:$4 sm:$0xff]  }
 0x1b7   :  { %2522 = vmatpush1.bf16.msra.mxu0 %v3827_v44  ;;  %v3914_v44 = vld [vmem:[#allocation8 + $0x708] ss:$16 sps:$4 sm:$0xff]  }
 0x1b8   :  { %2563 = vmatpush1.bf16.msra.mxu1 %v3830_v41  ;;  %2523 = vmatprep.subr.bf16.mxu0 %v3835_v45  ;;  %v3919_v41 = vld [vmem:[#allocation10 + $0x74] ss:$8 sps:$4 sm:$0xff]   ;;  %v3917_v45 = vld [vmem:[#allocation10 + $0x70] ss:$8 sps:$4 sm:$0xff]  }
 0x1b9   :  { %2564 = vmatprep.subr.bf16.mxu1 %v3838_v46  ;;  %v3922_v46 = vld [vmem:[#allocation10 + $0x64] ss:$8 sps:$4 sm:$0xff]  }
 0x1bb   :  { %2524 = vmatpush1.bf16.msra.mxu0 %v3833_v47 }
 0x1bc   :  { %2565 = vmatpush1.bf16.msra.mxu1 %v3836_v40  ;;  %2525 = vmatprep.subr.bf16.mxu0 %v3841_v48  ;;  %v3920_v48 = vld [vmem:[#allocation10 + $0x60] ss:$8 sps:$4 sm:$0xff]  }
 0x1bd   :  { %2566 = vmatprep.subr.bf16.mxu1 %v3844_v43 }
 0x1bf   :  { %2526 = vmatpush1.bf16.msra.mxu0 %v3839_v49  ;;  %v3925_v49 = vld [vmem:[#allocation10 + $0x54] ss:$8 sps:$4 sm:$0xff]  }
 0x1c0   :  { %2567 = vmatpush1.bf16.msra.mxu1 %v3842_v35  ;;  %2527 = vmatprep.subr.bf16.mxu0 %v3847_v50 }
 0x1c1   :  { %2568 = vmatprep.subr.bf16.mxu1 %v3850_v51 }
 0x1c3   :  { %2528 = vmatpush1.bf16.msra.mxu0 %v3845_v39  ;;  %v3923_v39 = vld [vmem:[#allocation10 + $0x50] ss:$8 sps:$4 sm:$0xff]  }
 0x1c4   :  { %2569 = vmatpush1.bf16.msra.mxu1 %v3848_v52  ;;  %2529 = vmatprep.subr.bf16.mxu0 %v3853_v53 }
 0x1c5   :  { %2570 = vmatprep.subr.bf16.mxu1 %v3856_v54  ;;  %v3965_v54 = vld [vmem:[#allocation10 + $0x170] ss:$8 sps:$4 sm:$0xff]  }
 0x1c7   :  { %2530 = vmatpush1.bf16.msra.mxu0 %v3851_v55  ;;  %v3970_v55 = vld [vmem:[#allocation10 + $0x164] ss:$8 sps:$4 sm:$0xff]  }
 0x1c8   :  { %2571 = vmatpush1.bf16.msra.mxu1 %v3854_v56  ;;  %2531 = vmatprep.subr.bf16.mxu0 %v3859_v57  ;;  %v3926_v56 = vld [vmem:[#allocation10 + $0x40] ss:$8 sps:$4 sm:$0xff]   ;;  %v3931_v57 = vld [vmem:[#allocation10 + $0x34] ss:$8 sps:$4 sm:$0xff]  }
 0x1c9   :  { %2572 = vmatprep.subr.bf16.mxu1 %v3862_v58  ;;  %v3968_v58 = vld [vmem:[#allocation10 + $0x160] ss:$8 sps:$4 sm:$0xff]  }
 0x1cb   :  { %2532 = vmatpush1.bf16.msra.mxu0 %v3857_v59  ;;  %v3973_v59 = vld [vmem:[#allocation10 + $0x154] ss:$8 sps:$4 sm:$0xff]  }
 0x1cc   :  { %2573 = vmatpush1.bf16.msra.mxu1 %v3860_v60  ;;  %2533 = vmatprep.subr.bf16.mxu0 %v3865_v61  ;;  %v3929_v60 = vld [vmem:[#allocation10 + $0x30] ss:$8 sps:$4 sm:$0xff]   ;;  %v3934_v61 = vld [vmem:[#allocation10 + $0x24] ss:$8 sps:$4 sm:$0xff]  }
 0x1cd   :  { %2574 = vmatprep.subr.bf16.mxu1 %v3868_v62  ;;  %v3971_v62 = vld [vmem:[#allocation10 + $0x150] ss:$8 sps:$4 sm:$0xff]  }
 0x1cf   :  { %2534 = vmatpush1.bf16.msra.mxu0 %v3863_v63  ;;  %v3976_v63 = vld [vmem:[#allocation10 + $0x144] ss:$8 sps:$4 sm:$0xff]  }
 0x1d0   :  { %2575 = vmatpush1.bf16.msra.mxu1 %v3866_v0  ;;  %2535 = vmatprep.subr.bf16.mxu0 %v3871_v2  ;;  %v3932_v0 = vld [vmem:[#allocation10 + $0x20] ss:$8 sps:$4 sm:$0xff]   ;;  %v3937_v2 = vld [vmem:[#allocation10 + $0x14] ss:$8 sps:$4 sm:$0xff]  }
 0x1d1   :  { %2576 = vmatprep.subr.bf16.mxu1 %v3874_v3  ;;  %v3974_v3 = vld [vmem:[#allocation10 + $0x140] ss:$8 sps:$4 sm:$0xff]  }
 0x1d3   :  { %2536 = vmatpush2.bf16.msra.mxu0 %v3869_v4  ;;  %v3979_v4 = vld [vmem:[#allocation10 + $0x134] ss:$8 sps:$4 sm:$0xff]  }
 0x1d4   :  { %2577 = vmatpush2.bf16.msra.mxu1 %v3872_v6  ;;  %2537 = vmatprep.subr.bf16.mxu0 %v3877_v7  ;;  %v3935_v6 = vld [vmem:[#allocation10 + $0x10] ss:$8 sps:$4 sm:$0xff]   ;;  %v3940_v7 = vld [vmem:[#allocation10 + $0x4] ss:$8 sps:$4 sm:$0xff]  }
 0x1d5   :  { %2578 = vmatprep.subr.bf16.mxu1 %v3880_v16  ;;  %v3977_v16 = vld [vmem:[#allocation10 + $0x130] ss:$8 sps:$4 sm:$0xff]  }
 0x1d7   :  { %2538 = vmatpush2.bf16.msra.mxu0 %v3875_v17  ;;  %v3982_v17 = vld [vmem:[#allocation10 + $0x124] ss:$8 sps:$4 sm:$0xff]  }
 0x1d8   :  { %2579 = vmatpush2.bf16.msra.mxu1 %v3878_v10  ;;  %2539 = vmatprep.subr.bf16.mxu0 %v3883_v18  ;;  %v3938_v10 = vld [vmem:[#allocation10] ss:$8 sps:$4 sm:$0xff]   ;;  %v3943_v18 = vld [vmem:[#allocation10 + $0xf4] ss:$8 sps:$4 sm:$0xff]  }
 0x1d9   :  { %2580 = vmatprep.subr.bf16.mxu1 %v3886_v19  ;;  %v3980_v19 = vld [vmem:[#allocation10 + $0x120] ss:$8 sps:$4 sm:$0xff]  }
 0x1db   :  { %2540 = vmatpush2.bf16.msra.mxu0 %v3881_v5  ;;  %v3985_v5 = vld [vmem:[#allocation10 + $0x114] ss:$8 sps:$4 sm:$0xff]  }
 0x1dc   :  { %2581 = vmatpush2.bf16.msra.mxu1 %v3884_v20  ;;  %2541 = vmatprep.subr.bf16.mxu0 %v3889_v21  ;;  %v3941_v20 = vld [vmem:[#allocation10 + $0xf0] ss:$8 sps:$4 sm:$0xff]   ;;  %v3946_v21 = vld [vmem:[#allocation10 + $0xe4] ss:$8 sps:$4 sm:$0xff]  }
 0x1dd   :  { %2582 = vmatprep.subr.bf16.mxu1 %v3892_v22  ;;  %v3983_v22 = vld [vmem:[#allocation10 + $0x110] ss:$8 sps:$4 sm:$0xff]  }
 0x1df   :  { %2542 = vmatpush2.bf16.msra.mxu0 %v3887_v15  ;;  %v3988_v15 = vld [vmem:[#allocation10 + $0x104] ss:$8 sps:$4 sm:$0xff]  }
 0x1e0   :  { %2583 = vmatpush2.bf16.msra.mxu1 %v3890_v23  ;;  %2543 = vmatprep.subr.bf16.mxu0 %v3895_v13  ;;  %v3944_v23 = vld [vmem:[#allocation10 + $0xe0] ss:$8 sps:$4 sm:$0xff]   ;;  %v3949_v13 = vld [vmem:[#allocation10 + $0xd4] ss:$8 sps:$4 sm:$0xff]  }
 0x1e1   :  { %2584 = vmatprep.subr.bf16.mxu1 %v3898_v25  ;;  %v3986_v25 = vld [vmem:[#allocation10 + $0x100] ss:$8 sps:$4 sm:$0xff]  }
 0x1e3   :  { %2544 = vmatpush2.bf16.msra.mxu0 %v3893_v27  ;;  %v3991_v27 = vld [vmem:[#allocation10 + $0x1f4] ss:$8 sps:$4 sm:$0xff]  }
 0x1e4   :  { %2585 = vmatpush2.bf16.msra.mxu1 %v3896_v28  ;;  %2545 = vmatprep.subr.bf16.mxu0 %v3901_v29  ;;  %v3947_v28 = vld [vmem:[#allocation10 + $0xd0] ss:$8 sps:$4 sm:$0xff]   ;;  %v3952_v29 = vld [vmem:[#allocation10 + $0xc4] ss:$8 sps:$4 sm:$0xff]  }
 0x1e5   :  { %2586 = vmatprep.subr.bf16.mxu1 %v3904_v30  ;;  %v3989_v30 = vld [vmem:[#allocation10 + $0x1f0] ss:$8 sps:$4 sm:$0xff]  }
 0x1e7   :  { %2546 = vmatpush2.bf16.msra.mxu0 %v3899_v31  ;;  %v3994_v31 = vld [vmem:[#allocation10 + $0x1e4] ss:$8 sps:$4 sm:$0xff]  }
 0x1e8   :  { %2587 = vmatpush2.bf16.msra.mxu1 %v3902_v32  ;;  %2547 = vmatprep.subr.bf16.mxu0 %v3907_v33  ;;  %v3950_v32 = vld [vmem:[#allocation10 + $0xc0] ss:$8 sps:$4 sm:$0xff]   ;;  %v3955_v33 = vld [vmem:[#allocation10 + $0xb4] ss:$8 sps:$4 sm:$0xff]  }
 0x1e9   :  { %2588 = vmatprep.subr.bf16.mxu1 %v3910_v34  ;;  %v3992_v34 = vld [vmem:[#allocation10 + $0x1e0] ss:$8 sps:$4 sm:$0xff]  }
 0x1eb   :  { %2548 = vmatpush2.bf16.msra.mxu0 %v3905_v36  ;;  %v3997_v36 = vld [vmem:[#allocation10 + $0x1d4] ss:$8 sps:$4 sm:$0xff]  }
 0x1ec   :  { %2589 = vmatpush2.bf16.msra.mxu1 %v3908_v37  ;;  %2549 = vmatprep.subr.bf16.mxu0 %v3913_v42  ;;  %v3953_v37 = vld [vmem:[#allocation10 + $0xb0] ss:$8 sps:$4 sm:$0xff]   ;;  %v3958_v42 = vld [vmem:[#allocation10 + $0xa4] ss:$8 sps:$4 sm:$0xff]  }
 0x1ed   :  { %2590 = vmatprep.subr.bf16.mxu1 %v3916_v38  ;;  %v3995_v38 = vld [vmem:[#allocation10 + $0x1d0] ss:$8 sps:$4 sm:$0xff]  }
 0x1ef   :  { %2550 = vmatpush2.bf16.msra.mxu0 %v3911_v1  ;;  %v4000_v1 = vld [vmem:[#allocation10 + $0x1c4] ss:$8 sps:$4 sm:$0xff]  }
 0x1f0   :  { %2591 = vmatpush2.bf16.msra.mxu1 %v3914_v44  ;;  %3009 = vmatprep.subr.bf16.mxu0 %v3919_v41  ;;  %v3956_v44 = vld [vmem:[#allocation10 + $0xa0] ss:$8 sps:$4 sm:$0xff]   ;;  %v3961_v41 = vld [vmem:[#allocation10 + $0x94] ss:$8 sps:$4 sm:$0xff]  }
 0x1f2   :  { %2552 = vmatmul.mubr.bf16.vlgmr.msra.gmra.mxu0 %v4267_v24  ;;  %v4280_v47 = vpop.f32.mrf.mxu0  ;;  %v4283_v40 = vpop.f32.mrf.mxu1  ;;  %v3928_v24 = vld [vmem:[#allocation10 + $0x44] ss:$8 sps:$4 sm:$0xff]  }
 0x1f3   :  { %2593 = vmatmul.mubr.bf16.vlgmr.msra.gmra.mxu1 %v4269_v26  ;;  %3010 = vmatpush1.bf16.msra.mxu0 %v3917_v45  ;;  %v3967_v26 = vld [vmem:[#allocation10 + $0x174] ss:$8 sps:$4 sm:$0xff]   ;;  %v3998_v45 = vld [vmem:[#allocation10 + $0x1c0] ss:$8 sps:$4 sm:$0xff]  }
 0x1f4   :  { %v4285_v43 = vpop.f32.mrf.mxu0  ;;  %3011 = vmatprep.subr.bf16.mxu0 %v3922_v46  ;;  %v4287_v35 = vpop.f32.mrf.mxu1  ;;  %3050 = vmatprep.subr.bf16.mxu1 %v3967_v26  ;;  %v4003_v46 = vld [vmem:[#allocation10 + $0x1b4] ss:$8 sps:$4 sm:$0xff]  }
 0x1f5   :  { %3051 = vmatpush1.bf16.msra.mxu1 %v3965_v54 }
 0x1f6   :  { %v2311_v50 = vpop.f32.mrf.mxu0  ;;  %v2352_v51 = vpop.f32.mrf.mxu1  ;;  %3052 = vmatprep.subr.bf16.mxu1 %v3970_v55 }
 0x1f7   :  { %3012 = vmatpush1.bf16.msra.mxu0 %v3920_v48  ;;  %v971_v48 = vld [vmem:[%s4319_s4] sm:$0xf] }
 0x1f8   :  { %v2312_v52 = vpop.f32.mrf.mxu0  ;;  %3013 = vmatprep.subr.bf16.mxu0 %v3925_v49  ;;  %v2353_v53 = vpop.f32.mrf.mxu1  ;;  %v3959_v49 = vld [vmem:[#allocation10 + $0x90] ss:$8 sps:$4 sm:$0xff]   ;;  %v3964_v50 = vld [vmem:[#allocation10 + $0x84] ss:$8 sps:$4 sm:$0xff]  }
 0x1f9   :  { %3053 = vmatpush1.bf16.msra.mxu1 %v3968_v58  ;;  %v4001_v51 = vld [vmem:[#allocation10 + $0x1b0] ss:$8 sps:$4 sm:$0xff]   ;;  %v980_v52 = vrot.slane %v971_v48, %v4222_v12 }
 0x1fa   :  { %3054 = vmatprep.subr.bf16.mxu1 %v3973_v59 }
 0x1fb   :  { %3014 = vmatpush1.bf16.msra.mxu0 %v3923_v39  ;;  %v976_v39 = vrot.slane %v971_v48, %v4216_v9  ;;  %v2310_v54 = vadd.f32 %v4285_v43, %v980_v52 }
 0x1fc   :  { %3015 = vmatprep.subr.bf16.mxu0 %v3928_v24  ;;  %v3962_v24 = vld [vmem:[#allocation10 + $0x80] ss:$8 sps:$4 sm:$0xff]  }
 0x1fd   :  { %3055 = vmatpush1.bf16.msra.mxu1 %v3971_v62  ;;  %v2308_v53 = vadd.f32 %v4280_v47, %v976_v39 }
 0x1fe   :  { %3056 = vmatprep.subr.bf16.mxu1 %v3976_v63 }
 0x1ff   :  { %3016 = vmatpush1.bf16.msra.mxu0 %v3926_v56  ;;  %v2349_v26 = vadd.f32 %v4283_v40, %v2308_v53  ;;  %v2351_v56 = vadd.f32 %v4287_v35, %v2310_v54 }
 0x200   :  { %3017 = vmatprep.subr.bf16.mxu0 %v3931_v57 }
 0x201   :  { %3057 = vmatpush1.bf16.msra.mxu1 %v3974_v3 }
 0x202   :  { %3058 = vmatprep.subr.bf16.mxu1 %v3979_v4 }
 0x203   :  { %3018 = vmatpush1.bf16.msra.mxu0 %v3929_v60  ;;  %v4006_v60 = vld [vmem:[#allocation10 + $0x1a4] ss:$8 sps:$4 sm:$0xff]  }
 0x204   :  { %3019 = vmatprep.subr.bf16.mxu0 %v3934_v61 }
 0x205   :  { %3059 = vmatpush1.bf16.msra.mxu1 %v3977_v16  ;;  %v4007_v16 = vld [vmem:[#allocation10 + $0x190] ss:$8 sps:$4 sm:$0xff]  }
 0x206   :  { %3060 = vmatprep.subr.bf16.mxu1 %v3982_v17 }
 0x207   :  { %3020 = vmatpush1.bf16.msra.mxu0 %v3932_v0  ;;  %v4004_v0 = vld [vmem:[#allocation10 + $0x1a0] ss:$8 sps:$4 sm:$0xff]  }
 0x208   :  { %3021 = vmatprep.subr.bf16.mxu0 %v3937_v2 }
 0x209   :  { %3061 = vmatpush1.bf16.msra.mxu1 %v3980_v19  ;;  %v4010_v19 = vld [vmem:[#allocation10 + $0x180] ss:$8 sps:$4 sm:$0xff]  }
 0x20a   :  { %3062 = vmatprep.subr.bf16.mxu1 %v3985_v5 }
 0x20b   :  { %3022 = vmatpush1.bf16.msra.mxu0 %v3935_v6  ;;  %v4009_v6 = vld [vmem:[#allocation10 + $0x194] ss:$8 sps:$4 sm:$0xff]  }
 0x20c   :  { %3023 = vmatprep.subr.bf16.mxu0 %v3940_v7 }
 0x20d   :  { %3063 = vmatpush1.bf16.msra.mxu1 %v3983_v22 }
 0x20e   :  { %3064 = vmatprep.subr.bf16.mxu1 %v3988_v15 }
 0x20f   :  { %3024 = vmatpush1.bf16.msra.mxu0 %v3938_v10  ;;  %v4012_v10 = vld [vmem:[#allocation10 + $0x184] ss:$8 sps:$4 sm:$0xff]  }
 0x210   :  { %3025 = vmatprep.subr.bf16.mxu0 %v3943_v18 }
 0x211   :  { %3065 = vmatpush1.bf16.msra.mxu1 %v3986_v25 }
 0x212   :  { %3066 = vmatprep.subr.bf16.mxu1 %v3991_v27 }
 0x213   :  { %3026 = vmatpush2.bf16.msra.mxu0 %v3941_v20 }
 0x214   :  { %3027 = vmatprep.subr.bf16.mxu0 %v3946_v21 }
 0x215   :  { %3067 = vmatpush2.bf16.msra.mxu1 %v3989_v30 }
 0x216   :  { %3068 = vmatprep.subr.bf16.mxu1 %v3994_v31 }
 0x217   :  { %3028 = vmatpush2.bf16.msra.mxu0 %v3944_v23 }
 0x218   :  { %3029 = vmatprep.subr.bf16.mxu0 %v3949_v13 }
 0x219   :  { %3069 = vmatpush2.bf16.msra.mxu1 %v3992_v34 }
 0x21a   :  { %3070 = vmatprep.subr.bf16.mxu1 %v3997_v36 }
 0x21b   :  { %3030 = vmatpush2.bf16.msra.mxu0 %v3947_v28  ;;  %v984_v28 = vrot.slane %v971_v48, %v177_v11 }
 0x21c   :  { %3031 = vmatprep.subr.bf16.mxu0 %v3952_v29  ;;  %v988_v29 = vrot.slane %v971_v48, %v181_v14 }
 0x21d   :  { %3071 = vmatpush2.bf16.msra.mxu1 %v3995_v38 }
 0x21e   :  { %3072 = vmatprep.subr.bf16.mxu1 %v4000_v1 }
 0x21f   :  { %3032 = vmatpush2.bf16.msra.mxu0 %v3950_v32 }
 0x220   :  { %3033 = vmatprep.subr.bf16.mxu0 %v3955_v33 }
 0x221   :  { %3073 = vmatpush2.bf16.msra.mxu1 %v3998_v45 }
 0x222   :  { %3074 = vmatprep.subr.bf16.mxu1 %v4003_v46 }
 0x223   :  { %3034 = vmatpush2.bf16.msra.mxu0 %v3953_v37 }
 0x224   :  { %3035 = vmatprep.subr.bf16.mxu0 %v3958_v42 }
 0x225   :  { %3075 = vmatpush2.bf16.msra.mxu1 %v4001_v51 }
 0x226   :  { %3076 = vmatprep.subr.bf16.mxu1 %v4006_v60 }
 0x227   :  { %3036 = vmatpush2.bf16.msra.mxu0 %v3956_v44 }
 0x228   :  { %3037 = vmatprep.subr.bf16.mxu0 %v3961_v41 }
 0x229   :  { %3077 = vmatpush2.bf16.msra.mxu1 %v4004_v0 }
 0x22a   :  { %3078 = vmatprep.subr.bf16.mxu1 %v4009_v6 }
 0x22b   :  { %3038 = vmatpush2.bf16.msra.mxu0 %v3959_v49 }
 0x22c   :  { %3039 = vmatprep.subr.bf16.mxu0 %v3964_v50 }
 0x22d   :  { %3079 = vmatpush2.bf16.msra.mxu1 %v4007_v16 }
 0x22e   :  { %3080 = vmatprep.subr.bf16.mxu1 %v4012_v10 }
 0x22f   :  { %3040 = vmatpush2.bf16.msra.mxu0 %v3962_v24 }
 0x231   :  { %3081 = vmatpush2.bf16.msra.mxu1 %v4010_v19 }
 0x232   :  { %v2389_v55 = vpop.f32.mrf.mxu0  ;;  %v2430_v58 = vpop.f32.mrf.mxu1 }
 0x233   :  { %v2390_v57 = vadd.f32 %v2389_v55, %v2349_v26  ;;  %v2677_v26 = vld [vmem:[%s4321_s6] sm:$0x3] }
 0x234   :  { %v2391_v59 = vpop.f32.mrf.mxu0  ;;  %v2432_v63 = vpop.f32.mrf.mxu1  ;;  %v2682_v55 = vrot.slane %v2677_v26, %v4216_v9 }
 0x235   :  { %v2431_v61 = vadd.f32 %v2430_v58, %v2390_v57  ;;  %v2392_v62 = vadd.f32 %v2391_v59, %v2351_v56  ;;  %v2686_v56 = vrot.slane %v2677_v26, %v4222_v12 }
 0x236   :  { %v2393_v2 = vpop.f32.mrf.mxu0  ;;  %v2434_v4 = vpop.f32.mrf.mxu1 }
 0x237   :  { %v2601_v3 = vmul.f32 0.01, %v2431_v61  ;;  %v2433_v47 = vadd.f32 %v2432_v63, %v2392_v62  ;;  %v3095_v62 = vld [vmem:[%s4322_s7] sm:$0x3] }
 0x238   :  { %v2394_v43 = vpop.f32.mrf.mxu0  ;;  %v2435_v7 = vpop.f32.mrf.mxu1  ;;  %v3100_v4 = vrot.slane %v3095_v62, %v4216_v9 }
 0x239   :  { %v2602_v40 = vmul.f32 0.01, %v2433_v47  ;;  %v2605_v35 = vmax.f32 %v2431_v61, %v2601_v3  ;;  %v3104_v43 = vrot.slane %v3095_v62, %v4222_v12 }
 0x23b   :  { %v2606_v17 = vmax.f32 %v2433_v47, %v2602_v40  ;;  %v2609_v5 = vpack.c.bf16 %v2605_v35, %v2605_v35 }
 0x23d   :  { %v2610_v18 = vpack.c.bf16 %v2606_v17, %v2606_v17  ;;  %v3519_v17 = vld [vmem:[#allocation2] ss:$0 sm:$0xff] }
 0x23f   :  { %3041 = vmatprep.mubr.bf16.mxu0 %v2610_v18 }
 0x240   :  { %3042 = vmatmul.mubr.bf16.vlgmr.msra.gmra.mxu0 %v2609_v5 }
 0x272   :  { %v2471_v20 = vpop.f32.mrf.mxu0 }
 0x273   :  { %v2512_v21 = vpop.f32.mrf.mxu1  ;;  %v2472_v30 = vadd.f32 %v2471_v20, %v984_v28 }
 0x274   :  { %v2473_v22 = vpop.f32.mrf.mxu0 }
 0x275   :  { %v2514_v15 = vpop.f32.mrf.mxu1  ;;  %v2474_v31 = vadd.f32 %v2473_v22, %v988_v29  ;;  %v2513_v32 = vadd.f32 %v2512_v21, %v2472_v30 }
 0x276   :  { %v2475_v23 = vpop.f32.mrf.mxu0 }
 0x277   :  { %v2516_v13 = vpop.f32.mrf.mxu1  ;;  %v2515_v34 = vadd.f32 %v2514_v15, %v2474_v31 }
 0x278   :  { %v2476_v25 = vpop.f32.mrf.mxu0 }
 0x279   :  { %v2517_v27 = vpop.f32.mrf.mxu1 }
 0x2b2   :  { %v2553_v33 = vpop.f32.mrf.mxu0 }
 0x2b3   :  { %v2554_v36 = vadd.f32 %v2553_v33, %v2513_v32  ;;  %v2594_v37 = vpop.f32.mrf.mxu1 }
 0x2b4   :  { %v2555_v42 = vpop.f32.mrf.mxu0 }
 0x2b5   :  { %v2595_v38 = vadd.f32 %v2594_v37, %v2554_v36  ;;  %v2556_v1 = vadd.f32 %v2555_v42, %v2515_v34  ;;  %v2596_v44 = vpop.f32.mrf.mxu1 }
 0x2b6   :  { %v2557_v41 = vpop.f32.mrf.mxu0 }
 0x2b7   :  { %v2603_v45 = vmul.f32 0.01, %v2595_v38  ;;  %v2597_v46 = vadd.f32 %v2596_v44, %v2556_v1  ;;  %v2598_v49 = vpop.f32.mrf.mxu1 }
 0x2b8   :  { %v2558_v50 = vpop.f32.mrf.mxu0 }
 0x2b9   :  { %v2604_v11 = vmul.f32 0.01, %v2597_v46  ;;  %v2599_v51 = vpop.f32.mrf.mxu1  ;;  %v2607_v8 = vmax.f32 %v2595_v38, %v2603_v45 }
 0x2bb   :  { %v2608_v14 = vmax.f32 %v2597_v46, %v2604_v11  ;;  %v2611_v39 = vpack.c.bf16 %v2607_v8, %v2607_v8 }
 0x2bd   :  { %v2612_v48 = vpack.c.bf16 %v2608_v14, %v2608_v14 }
 0x2bf   :  { %3082 = vmatprep.mubr.bf16.mxu1 %v2612_v48 }
 0x2c0   :  { %3083 = vmatmul.mubr.bf16.vlgmr.msra.gmra.mxu1 %v2611_v39 }
 0x300   :  { %v3043_v52 = vpop.f32.mrf.mxu0 }
 0x301   :  { %v3044_v57 = vadd.f32 %v3043_v52, %v2682_v55 }
 0x302   :  { %v3045_v24 = vpop.f32.mrf.mxu0 }
 0x303   :  { %v3046_v59 = vadd.f32 %v3045_v24, %v2686_v56 }
 0x304   :  { %v3047_v53 = vpop.f32.mrf.mxu0 }
 0x306   :  { %v3048_v54 = vpop.f32.mrf.mxu0 }
 0x380   :  { %v3084_v58 = vpop.f32.mrf.mxu1 }
 0x381   :  { %v3085_v60 = vadd.f32 %v3084_v58, %v3044_v57 }
 0x382   :  { %v3086_v61 = vpop.f32.mrf.mxu1 }
 0x383   :  { %v3091_v63 = vmul.f32 0.01, %v3085_v60  ;;  %v3087_v0 = vadd.f32 %v3086_v61, %v3046_v59 }
 0x384   :  { %v3088_v2 = vpop.f32.mrf.mxu1 }
 0x385   :  { %v3093_v3 = vmax.f32 %v3085_v60, %v3091_v63  ;;  %v3092_v47 = vmul.f32 0.01, %v3087_v0 }
 0x386   :  { %v3089_v6 = vpop.f32.mrf.mxu1 }
 0x387   :  { %v3094_v40 = vmax.f32 %v3087_v0, %v3092_v47  ;;  %v3107_v7 = vmul.f32 %v3100_v4, %v3093_v3 }
 0x389   :  { %v3108_v16 = vmul.f32 %v3104_v43, %v3094_v40 }
 0x38b   :  { %v3109_v35 = vadd.f32 %v3108_v16, %v3107_v7 }
 0x38d   :  { %3110 = vadd.xlane.f32.xlu0 %v3109_v35 }
 0x416   :  { %v3111_v10 = vpop.xlane.xlu0 %3110 }
 0x417   :  { %v3119_v18 = vadd.f32 %v3519_v17, %v3111_v10 }
 0x419   :  { %v3520_v19 = vmul.f32 -1.442695, %v3119_v18 }
 0x41b   :  { %4013 = vpow2.f32 %v3520_v19 }
 0x428   :  { %v4014_v5 = vpop.eup %4013 }
 0x429   :  { %v3123_v20 = vadd.f32 1.0, %v4014_v5 }
 0x42b   :  { %4015 = vrcp.f32 %v3123_v20 }
 0x438   :  { %v4016_v21 = vpop.eup %4015 }
 0x439   :  { %3127 = vst.msk [vmem:[%s4324_s9] sm:$0xff] %vm3126_vm0, %v4016_v21 }
 0x43a   :  { %3132 = vsyncpa [#allocation4], 1 }
 0x43b   :  { %3133 = vsyncpa [#allocation6], 1 }
 0x43c   :  { %3134 = vsyncpa [#allocation9], 1 }

</bundles_post_ra>
